<compile_context>
chip_gen: v7x
topology: tpu7x:2x2x1
jax: 0.10.0
libtpu: 0.0.40
codegen_flags: <defaults>
</compile_context>

<pallas_src>
import functools

import jax
import jax.numpy as jnp
from jax.experimental import pallas as pl
from jax.experimental.pallas import tpu as pltpu

LANE = 128
SUB = 8
TSUB = 16          # bf16 sublane packing -> keep time tiles / halos 16-row aligned
_BN_EPS = 1e-5


def _ru(x, m):
    return ((x + m - 1) // m) * m


def _cdiv(a, b):
    return -(-a // b)


def _cparams(vmem_limit, *sems):
    return pltpu.CompilerParams(dimension_semantics=sems,
                                vmem_limit_bytes=int(vmem_limit))


def _chip_profile():
    """Per-generation VMEM budget, default WN time tile, bf16-gate flag."""
    kind = ""
    try:
        kind = jax.devices()[0].device_kind.lower()
    except Exception:
        pass
    cap = None
    try:
        cap = int(pltpu.get_tpu_info().vmem_capacity_bytes)
    except Exception:
        cap = None
    if cap is None:
        if 'v2' in kind or 'v3' in kind:
            cap = 16 * 1024 * 1024
        elif 'v4' in kind or 'v5' in kind or 'v6' in kind:
            cap = 128 * 1024 * 1024
        else:                                   # v7x / unknown: assume small VMEM
            cap = 64 * 1024 * 1024
    if cap >= 100 * 1024 * 1024:                # v4 / v5e / v6e : 128 MiB physical
        vmem_limit, wn_tile = cap - 24 * 1024 * 1024, 2048
    elif cap >= 48 * 1024 * 1024:               # v7x : 64 MiB physical, leave headroom
        vmem_limit, wn_tile = (cap * 3) // 4, 1024
    else:                                       # v2/v3 fallback
        vmem_limit, wn_tile = (cap * 3) // 4, 512
    # bf16 VPU/EUP exists on v6e/v7x; keep the gate nonlinearity in f32 elsewhere.
    gate_bf16 = any(tag in kind for tag in ('v6', 'v7', '7x'))
    return vmem_limit, wn_tile, gate_bf16


# ----------------------------------------------------------------------------
# Kernel 1: M/N-tiled matmul + bias (bf16 MXU inputs, f32 accumulate)
# ----------------------------------------------------------------------------
def _mm_bias_kernel(x_ref, w_ref, b_ref, o_ref):
    o_ref[...] = (jnp.dot(x_ref[...], w_ref[...],
                          preferred_element_type=jnp.float32)
                  + b_ref[...]).astype(o_ref.dtype)


def mm_bias(x, w, b, out_dtype=jnp.float32, vmem_limit=48 * 1024 * 1024,
            tile_m=512, tile_n=2048):
    """y = x @ w + b ; x:(M,K) w:(K,N) b:(N,) -> (M,N), tiled over M AND N so the
    production upsample matmul (N = 60*emb) fits v7x's 64 MiB VMEM."""
    M, K = x.shape
    N = w.shape[1]
    tm = min(_ru(tile_m, SUB), _ru(M, SUB))
    tn = min(_ru(tile_n, LANE), _ru(N, LANE))
    Mp, Np = _ru(M, tm), _ru(N, tn)
    xp = jnp.pad(x.astype(jnp.bfloat16), ((0, Mp - M), (0, 0)))
    wp = jnp.pad(w.astype(jnp.bfloat16), ((0, 0), (0, Np - N)))
    bp = jnp.pad(b.astype(jnp.float32), (0, Np - N)).reshape(1, Np)
    out = pl.pallas_call(
        _mm_bias_kernel,
        grid=(Mp // tm, Np // tn),
        in_specs=[pl.BlockSpec((tm, K), lambda i, j: (i, 0)),
                  pl.BlockSpec((K, tn), lambda i, j: (0, j)),
                  pl.BlockSpec((1, tn), lambda i, j: (0, j))],
        out_specs=pl.BlockSpec((tm, tn), lambda i, j: (i, j)),
        out_shape=jax.ShapeDtypeStruct((Mp, Np), out_dtype),
        compiler_params=_cparams(vmem_limit, "parallel", "parallel"),
    )(xp, wp, bp)
    return out[:M, :N]


# ----------------------------------------------------------------------------
# Kernel 2: fused encoder (n_convs x (Conv1d 'same' + eval-BatchNorm + ReLU)),
#           time-tiled with an in-kernel halo DMA; emits bf16.
# ----------------------------------------------------------------------------
def _encoder_kernel(x_hbm, w_ref, scale_ref, shift_ref, o_ref, x_buf, sem,
                    *, n_convs, ksize, tile_t, halo, seq_len):
    # TODO(synk): nn.Dropout(0.5) after each ReLU is identity in eval mode.
    p1 = (ksize - 1) // 2
    lth = tile_t + 2 * halo
    b = pl.program_id(0)
    t = pl.program_id(1)
    w0 = pl.multiple_of(t * tile_t, TSUB)

    cp = pltpu.make_async_copy(x_hbm.at[b, pl.ds(w0, lth), :], x_buf, sem.at[0])
    cp.start()
    cp.wait()

    row = jax.lax.broadcasted_iota(jnp.int32, (lth, 1), 0)
    gpos = w0 - halo + row                      # global time index of each window row
    in_seq = jnp.logical_and(gpos >= 0, gpos < seq_len)

    h = x_buf[...]                              # (lth, Ep) bf16, zero outside [0, seq_len)
    off, valid = 0, lth
    for i in range(n_convs):
        nv = valid - 2 * p1
        hb = h if i == 0 else h.astype(jnp.bfloat16)     # hoisted cast (once per layer)
        acc = jnp.zeros((nv, hb.shape[1]), jnp.float32)
        for k in range(ksize):
            acc = acc + jnp.dot(hb[k:k + nv], w_ref[i, k],
                                preferred_element_type=jnp.float32)
        y = jnp.maximum(acc * scale_ref[i] + shift_ref[i], 0.0)
        off += p1
        h = jnp.where(in_seq[off:off + nv], y, 0.0)      # emulate torch zero padding
        valid = nv
    ctr = halo - off                                     # start of the central tile rows
    o_ref[0] = h[ctr:ctr + tile_t].astype(o_ref.dtype)


def encoder_convs(x, w, scale, shift, vmem_limit, tile_t=256):
    """x:(B,T,E) f32; w:(n_convs,K,Ep,Ep) bf16; scale,shift:(n_convs,1,Ep).
    Returns (B,T,Ep) bf16.  Grid=(batch, time-tiles), both 'parallel' (v7x megacore)."""
    B, T, E = x.shape
    n_convs, K, Ep, _ = w.shape
    p1 = (K - 1) // 2
    halo = _ru(n_convs * p1, TSUB)
    tile = max(TSUB, min(_ru(tile_t, TSUB), _ru(T, TSUB)))
    n_t = _cdiv(T, tile)
    t_pad = n_t * tile
    lth = tile + 2 * halo
    xp = jnp.pad(x, ((0, 0), (halo, t_pad - T + halo), (0, Ep - E))).astype(jnp.bfloat16)
    kern = functools.partial(_encoder_kernel, n_convs=n_convs, ksize=K,
                             tile_t=tile, halo=halo, seq_len=T)
    out = pl.pallas_call(
        kern,
        grid=(B, n_t),
        in_specs=[pl.BlockSpec(memory_space=pl.ANY),
                  pl.BlockSpec(w.shape, lambda b, t: (0, 0, 0, 0)),
                  pl.BlockSpec(scale.shape, lambda b, t: (0, 0, 0)),
                  pl.BlockSpec(shift.shape, lambda b, t: (0, 0, 0))],
        out_specs=pl.BlockSpec((1, tile, Ep), lambda b, t: (b, t, 0)),
        out_shape=jax.ShapeDtypeStruct((B, t_pad, Ep), jnp.bfloat16),
        scratch_shapes=[pltpu.VMEM((lth, Ep), jnp.bfloat16),
                        pltpu.SemaphoreType.DMA((1,))],
        compiler_params=_cparams(vmem_limit, "parallel", "parallel"),
    )(xp, w, scale, shift)
    return out[:, :T, :]


# ----------------------------------------------------------------------------
# Kernel 3: fused WN flow (start + dilated gates + res/skip + end + coupling)
# ----------------------------------------------------------------------------
def _wn_flow_kernel(z0_hbm, cond_hbm, z1_ref,
                    start_w_ref, start_b_ref,
                    in_w_ref, gate_b_ref, cond_w_ref,
                    res_w_ref, res_b_ref,
                    skip_w_ref, skip_b_ref,
                    end_wa_ref, end_ba_ref, end_ws_ref, end_bs_ref,
                    out_ref,
                    z0_buf, cond_buf, sem,
                    *, n_layers, ksize, tile_l, halo, seq_len, c_pad, gate_bf16):
    lth = tile_l + 2 * halo
    b = pl.program_id(0)
    t = pl.program_id(1)
    w0 = pl.multiple_of(t * tile_l, TSUB)       # window start in the halo-padded arrays

    # Fetch the overlapping halo windows straight from HBM (no pre-duplicated copies).
    cp_z = pltpu.make_async_copy(z0_hbm.at[b, pl.ds(w0, lth), :], z0_buf, sem.at[0])
    cp_c = pltpu.make_async_copy(cond_hbm.at[b, pl.ds(w0, lth), :], cond_buf, sem.at[1])
    cp_z.start()
    cp_c.start()
    cp_z.wait()
    cp_c.wait()

    row = jax.lax.broadcasted_iota(jnp.int32, (lth, 1), 0)
    gpos = w0 - halo + row                      # global time index of each window row
    in_seq = jnp.logical_and(gpos >= 0, gpos < seq_len)   # emulate torch zero padding

    z0 = z0_buf[...]                            # (lth, hc) bf16
    cond = cond_buf[...]                        # (lth, E)  bf16 (no f32 round trip)

    # WN start 1x1 conv; zero rows outside the real sequence.
    h = jnp.dot(z0, start_w_ref[...],
                preferred_element_type=jnp.float32) + start_b_ref[...]
    h = jnp.where(in_seq, h, 0.0)

    skip = jnp.zeros((tile_l, c_pad), jnp.float32) + skip_b_ref[...]

    off, valid = 0, lth
    for i in range(n_layers):
        d = 2 ** i
        s = d * (ksize - 1) // 2
        nv = valid - 2 * s
        hb = h.astype(jnp.bfloat16)             # hoisted cast (once per layer)
        c_in = cond[off + s:off + s + nv]       # bf16 slice, no cast
        # Fused tanh/sigmoid gate matmuls: tanh half in lanes [0,c_pad),
        # sigmoid half in lanes [c_pad,2*c_pad) -> split is 128-lane aligned (free).
        acc = jnp.dot(c_in, cond_w_ref[i],
                      preferred_element_type=jnp.float32) + gate_b_ref[i]
        for k in range(ksize):                  # dilated conv taps
            acc = acc + jnp.dot(hb[k * d:k * d + nv], in_w_ref[i, k],
                                preferred_element_type=jnp.float32)
        acc_t = acc[:, :c_pad]
        acc_s = acc[:, c_pad:]
        if gate_bf16:                           # bf16 EUP/VPU on v6e / v7x
            acts_b = (jnp.tanh(acc_t.astype(jnp.bfloat16))
                      * jax.nn.sigmoid(acc_s.astype(jnp.bfloat16)))
        else:                                   # keep f32 on v5e and older
            acts_b = (jnp.tanh(acc_t) * jax.nn.sigmoid(acc_s)).astype(jnp.bfloat16)
        ctr = halo - (off + s)                  # start of the central tile rows
        skip = skip + jnp.dot(acts_b[ctr:ctr + tile_l], skip_w_ref[i],
                              preferred_element_type=jnp.float32)
        if i < n_layers - 1:
            res = jnp.dot(acts_b, res_w_ref[i],
                          preferred_element_type=jnp.float32) + res_b_ref[i]
            h = res + h[s:s + nv]
            h = jnp.where(in_seq[off + s:off + s + nv], h, 0.0)
        off += s
        valid = nv

    # Fused end 1x1 conv + affine coupling epilogue, single merged lane-packed output.
    # end_wa packs [b | log_s]; end_ws packs [log_s | 0]; z1_ref is [z1 | 0]:
    #   out = exp(s_full) * z1 + a_full = [ exp(log_s)*z1 + b | log_s ]
    # The end matmuls are kept in f32 (tiny N; exp(log_s) amplifies matmul error).
    a_full = jnp.dot(skip, end_wa_ref[...],
                     preferred_element_type=jnp.float32) + end_ba_ref[...]
    s_full = jnp.dot(skip, end_ws_ref[...],
                     preferred_element_type=jnp.float32) + end_bs_ref[...]
    out_ref[0] = jnp.exp(s_full) * z1_ref[0] + a_full


def wn_tiling(L, n_layers, ksize, max_tile):
    halo = _ru(max(1, (ksize - 1) // 2 * (2 ** n_layers - 1)), TSUB)
    tile_l = max(TSUB, min(_ru(max_tile, TSUB), _ru(L, TSUB)))
    n_t = _cdiv(L, tile_l)
    return tile_l, halo, n_t, n_t * tile_l


def wn_flow_coupling(fw, z0, z1, cond_pad, seq_len, tile_l, halo, l_pad,
                     gate_bf16, vmem_limit):
    """Fused WN + affine coupling for one flow (single pallas_call).
    z0,z1:(B,L,n_half) f32; cond_pad:(B,l_pad+2*halo,E) bf16 (shared across flows).
    Returns z1_new, log_s : (B,L,n_half) f32."""
    B, L, n_half = z0.shape
    nl, K = fw['n_layers'], fw['ksize']
    hc = fw['start_w'].shape[0]
    c_pad = fw['start_w'].shape[1]
    lth = tile_l + 2 * halo
    n_t = l_pad // tile_l
    E = cond_pad.shape[-1]

    # Halo-padded z0 (zero outside [0,L)); z1 padded into the [z1 | 0] layout the
    # merged coupling epilogue expects.
    z0_pad = jnp.pad(z0, ((0, 0), (halo, l_pad - L + halo),
                          (0, hc - n_half))).astype(jnp.bfloat16)
    z1p = jnp.pad(z1, ((0, 0), (0, l_pad - L), (0, 2 * hc - n_half)))

    kern = functools.partial(_wn_flow_kernel, n_layers=nl, ksize=K, tile_l=tile_l,
                             halo=halo, seq_len=seq_len, c_pad=c_pad,
                             gate_bf16=gate_bf16)

    def _full(arr):
        nd = arr.ndim
        return pl.BlockSpec(arr.shape, lambda b, t, _n=nd: (0,) * _n)

    w_names = ['start_w', 'start_b', 'in_w', 'gate_b', 'cond_w',
               'res_w', 'res_b', 'skip_w', 'skip_b',
               'end_wa', 'end_ba', 'end_ws', 'end_bs']
    w_args = [fw[n] for n in w_names]

    out = pl.pallas_call(
        kern,
        grid=(B, n_t),
        in_specs=[pl.BlockSpec(memory_space=pl.ANY),
                  pl.BlockSpec(memory_space=pl.ANY),
                  pl.BlockSpec((1, tile_l, 2 * hc), lambda b, t: (b, t, 0))]
                 + [_full(a) for a in w_args],
        out_specs=pl.BlockSpec((1, tile_l, 2 * hc), lambda b, t: (b, t, 0)),
        out_shape=jax.ShapeDtypeStruct((B, l_pad, 2 * hc), jnp.float32),
        scratch_shapes=[pltpu.VMEM((lth, hc), jnp.bfloat16),
                        pltpu.VMEM((lth, E), jnp.bfloat16),
                        pltpu.SemaphoreType.DMA((2,))],
        compiler_params=_cparams(vmem_limit, "parallel", "parallel"),
    )(z0_pad, cond_pad, z1p, *w_args)
    return out[:, :L, :n_half], out[:, :L, hc:hc + n_half]


# ----------------------------------------------------------------------------
# Parameters (synthetic) and one-time packing into kernel layouts
# ----------------------------------------------------------------------------
def _normal(key, shape, scale=0.1):
    return scale * jax.random.normal(key, shape, dtype=jnp.float32)


def make_params(key, cfg):
    p = {}
    k_iter = iter(jax.random.split(key, 512))
    nk = lambda: next(k_iter)
    emb = cfg['encoder_embedding_dim']

    p['embedding'] = _normal(nk(), (cfg['n_symbols'], cfg['symbols_embedding_dim']), 1.0)

    K = cfg['encoder_kernel_size']
    p['enc_convs'] = [{'w': _normal(nk(), (K, emb, emb)), 'b': _normal(nk(), (emb,))}
                      for _ in range(cfg['encoder_n_convolutions'])]

    H = emb // 2
    p['lstm'] = {d: {'W_ih': _normal(nk(), (4 * H, emb)),
                     'W_hh': _normal(nk(), (4 * H, H)),
                     'b': _normal(nk(), (4 * H,))}            # b_ih + b_hh combined
                 for d in ('fwd', 'bwd')}

    p['upsample_w'] = _normal(nk(), (emb, emb, 60))           # (Cin, Cout, K), torch layout
    p['upsample_b'] = _normal(nk(), (emb,))

    wn_cfg = cfg['WN_config']
    nc, nl, ks = wn_cfg['n_channels'], wn_cfg['n_layers'], wn_cfg['kernel_size']
    n_half, n_rem = cfg['n_group'] // 2, cfg['n_group']
    flows = []
    for fk in range(cfg['n_flows']):
        if fk % cfg['n_early_every'] == 0 and fk > 0:
            n_half -= cfg['n_early_size'] // 2
            n_rem -= cfg['n_early_size']
        A = jax.random.normal(nk(), (n_rem, n_rem), dtype=jnp.float32)
        Q, _ = jnp.linalg.qr(A)
        Q = jnp.where(jnp.linalg.det(Q) < 0, Q.at[:, 0].multiply(-1.0), Q)
        # NOTE: real WaveGlow zero-inits the end layer; small random values are used
        # here so the runtime self-check exercises the whole WN path.  weight_norm is
        # identity at init, so plain weights are used.
        wn = {'start_w': _normal(nk(), (n_half, nc)), 'start_b': _normal(nk(), (nc,)),
              'end_w': _normal(nk(), (nc, 2 * n_half), 0.05),
              'end_b': _normal(nk(), (2 * n_half,), 0.05),
              'in_w': [], 'in_b': [], 'cond_w': [], 'cond_b': [],
              'res_w': [], 'res_b': [], 'skip_w': [], 'skip_b': []}
        for i in range(nl):
            wn['in_w'].append(_normal(nk(), (ks, nc, 2 * nc)))
            wn['in_b'].append(_normal(nk(), (2 * nc,)))
            wn['cond_w'].append(_normal(nk(), (emb, 2 * nc)))
            wn['cond_b'].append(_normal(nk(), (2 * nc,)))
            if i < nl - 1:
                wn['res_w'].append(_normal(nk(), (nc, nc)))
                wn['res_b'].append(_normal(nk(), (nc,)))
            wn['skip_w'].append(_normal(nk(), (nc, nc)))
            wn['skip_b'].append(_normal(nk(), (nc,)))
        flows.append({'invconv_w': Q, 'wn': wn, 'n_half': n_half, 'n_rem': n_rem})
    p['flows'] = flows
    return p


def pack_params(p, cfg):
    """Pad/stack/bf16-cast parameters once into the layouts the Pallas kernels use."""
    emb = cfg['encoder_embedding_dim']
    ep = _ru(emb, LANE)
    bf = jnp.bfloat16

    # Encoder: general eval-BatchNorm fold (scale = gamma / sqrt(var + eps);
    # shift = beta + (conv_b - mean) * scale).  Synthetic params correspond to fresh
    # running stats: gamma=1, beta=0, mean=0, var=1.  NOTE: when loading a real
    # checkpoint the real running stats MUST be plugged in here.
    enc_w, enc_scale, enc_shift = [], [], []
    for c in p['enc_convs']:
        gamma = jnp.ones((emb,), jnp.float32)
        beta = jnp.zeros((emb,), jnp.float32)
        mean = jnp.zeros((emb,), jnp.float32)
        var = jnp.ones((emb,), jnp.float32)
        scale = gamma / jnp.sqrt(var + _BN_EPS)
        shift = beta + (c['b'] - mean) * scale
        enc_w.append(jnp.pad(c['w'], ((0, 0), (0, ep - emb), (0, ep - emb))))
        enc_scale.append(jnp.pad(scale, (0, ep - emb)))
        enc_shift.append(jnp.pad(shift, (0, ep - emb)))
    packed = {
        'embedding': p['embedding'],
        'enc_w': jnp.stack(enc_w).astype(bf),
        'enc_scale': jnp.stack(enc_scale)[:, None, :],
        'enc_shift': jnp.stack(enc_shift)[:, None, :],
    }

    # LSTM: both directions' input projections batched into one matmul.
    lf, lb = p['lstm']['fwd'], p['lstm']['bwd']
    packed['lstm_in_w'] = jnp.concatenate([lf['W_ih'].T, lb['W_ih'].T], axis=1)
    packed['lstm_in_b'] = jnp.concatenate([lf['b'], lb['b']])
    packed['lstm_hh'] = (lf['W_hh'], lb['W_hh'])

    # Upsample ConvTranspose1d as a (emb -> K*emb) matmul + overlap-add.
    K_up = p['upsample_w'].shape[2]
    packed['upsample_w_mat'] = jnp.transpose(p['upsample_w'], (0, 2, 1)).reshape(emb, K_up * emb)
    packed['upsample_b'] = p['upsample_b']
    packed['upsample_k'] = K_up

    wn_cfg = cfg['WN_config']
    nc, nl, ks = wn_cfg['n_channels'], wn_cfg['n_layers'], wn_cfg['kernel_size']
    c_pad = _ru(nc, LANE)
    pc = c_pad - nc
    flows = []
    for fl in p['flows']:
        wn = fl['wn']
        n_half = fl['n_half']
        hc = _ru(n_half, SUB)

        in_w = jnp.stack(wn['in_w'])                              # (nl, ks, nc, 2nc)
        cond_w = jnp.stack(wn['cond_w'])                          # (nl, emb, 2nc)
        gate_b = jnp.stack(wn['in_b']) + jnp.stack(wn['cond_b'])  # (nl, 2nc)
        res_w = list(wn['res_w']) + [jnp.zeros((nc, nc), jnp.float32)] * (nl - len(wn['res_w']))
        res_b = list(wn['res_b']) + [jnp.zeros((nc,), jnp.float32)] * (nl - len(wn['res_b']))

        # Fused tanh/sigmoid halves: tanh weights in lanes [0, c_pad), sigmoid weights
        # in [c_pad, 2*c_pad) so the in-kernel split is 128-lane aligned.
        in_w_f = jnp.zeros((nl, ks, c_pad, 2 * c_pad), jnp.float32)
        in_w_f = in_w_f.at[:, :, :nc, :nc].set(in_w[..., :nc])
        in_w_f = in_w_f.at[:, :, :nc, c_pad:c_pad + nc].set(in_w[..., nc:])
        cond_w_f = jnp.zeros((nl, emb, 2 * c_pad), jnp.float32)
        cond_w_f = cond_w_f.at[:, :, :nc].set(cond_w[..., :nc])
        cond_w_f = cond_w_f.at[:, :, c_pad:c_pad + nc].set(cond_w[..., nc:])
        gate_b_f = jnp.zeros((nl, 2 * c_pad), jnp.float32)
        gate_b_f = gate_b_f.at[:, :nc].set(gate_b[:, :nc])
        gate_b_f = gate_b_f.at[:, c_pad:c_pad + nc].set(gate_b[:, nc:])

        # Fused coupling epilogue weights (f32):
        #   a_full = skip @ end_wa + end_ba = [ b     | log_s ]
        #   s_full = skip @ end_ws + end_bs = [ log_s | 0     ]
        end_w, end_b = wn['end_w'], wn['end_b']
        end_wa = jnp.zeros((c_pad, 2 * hc), jnp.float32)
        end_wa = end_wa.at[:nc, :n_half].set(end_w[:, :n_half])
        end_wa = end_wa.at[:nc, hc:hc + n_half].set(end_w[:, n_half:])
        end_ba = jnp.zeros((2 * hc,), jnp.float32)
        end_ba = end_ba.at[:n_half].set(end_b[:n_half])
        end_ba = end_ba.at[hc:hc + n_half].set(end_b[n_half:])
        end_ws = jnp.zeros((c_pad, 2 * hc), jnp.float32)
        end_ws = end_ws.at[:nc, :n_half].set(end_w[:, n_half:])
        end_bs = jnp.zeros((2 * hc,), jnp.float32)
        end_bs = end_bs.at[:n_half].set(end_b[n_half:])

        fw = {
            'n_layers': nl, 'ksize': ks,
            'start_w': jnp.pad(wn['start_w'], ((0, hc - n_half), (0, pc))).astype(bf),
            'start_b': jnp.pad(wn['start_b'], (0, pc)).reshape(1, c_pad),
            'in_w': in_w_f.astype(bf),
            'gate_b': gate_b_f[:, None, :],
            'cond_w': cond_w_f.astype(bf),
            'res_w': jnp.pad(jnp.stack(res_w), ((0, 0), (0, pc), (0, pc))).astype(bf),
            'res_b': jnp.pad(jnp.stack(res_b), ((0, 0), (0, pc)))[:, None, :],
            'skip_w': jnp.pad(jnp.stack(wn['skip_w']), ((0, 0), (0, pc), (0, pc))).astype(bf),
            'skip_b': jnp.pad(sum(wn['skip_b']), (0, pc)).reshape(1, c_pad),
            'end_wa': end_wa, 'end_ba': end_ba.reshape(1, 2 * hc),
            'end_ws': end_ws, 'end_bs': end_bs.reshape(1, 2 * hc),
        }
        flows.append({'invconv_w': fl['invconv_w'], 'wn': fw,
                      'n_half': n_half, 'n_rem': fl['n_rem']})
    packed['flows'] = flows
    return packed


# ----------------------------------------------------------------------------
# Forward pass
# ----------------------------------------------------------------------------
def _regroup_spec(spec, n_group):
    B, n_mel, frames = spec.shape
    st = jnp.transpose(spec, (0, 2, 1))                       # (B, frames, n_mel)
    st = st.reshape(B, frames, n_mel // n_group, n_group)     # unfold(2, g, g)
    st = jnp.transpose(st, (0, 2, 1, 3))                      # permute(0, 2, 1, 3)
    sg = st.reshape(B, n_group, (n_mel // n_group) * frames)  # contiguous().view
    return jnp.transpose(sg, (0, 2, 1))                       # channels-last (B, L, g)


def waveglow_forward(packed, cfg, text_seq, spec):
    B, T_text = text_seq.shape
    emb = cfg['encoder_embedding_dim']
    wn_cfg = cfg['WN_config']
    vmem_limit, wn_tile_default, gate_bf16 = _chip_profile()

    # --- Embedding gather (plain JAX)
    x = jnp.take(packed['embedding'], text_seq, axis=0)               # (B, T_text, emb)

    # --- Encoder: fused conv stack (Pallas, bf16 out)
    xe = encoder_convs(x, packed['enc_w'], packed['enc_scale'], packed['enc_shift'],
                       vmem_limit)
    xe = xe[:, :, :emb]

    # --- Bidirectional LSTM: batched input projection (Pallas, f32 out so the
    #     recurrence accumulates in f32), recurrence via lax.scan
    H = emb // 2
    proj = mm_bias(xe.reshape(B * T_text, emb), packed['lstm_in_w'],
                   packed['lstm_in_b'], out_dtype=jnp.float32,
                   vmem_limit=vmem_limit).reshape(B, T_text, 8 * H)

    def run_dir(gx_seq, w_hh, reverse):
        def step(carry, gx):
            h, c = carry
            gates = gx + h @ w_hh.T
            i, f, g, o = jnp.split(gates, 4, axis=-1)
            c = jax.nn.sigmoid(f) * c + jax.nn.sigmoid(i) * jnp.tanh(g)
            h = jax.nn.sigmoid(o) * jnp.tanh(c)
            return (h, c), h
        init = (jnp.zeros((B, H), jnp.float32), jnp.zeros((B, H), jnp.float32))
        _, ys = jax.lax.scan(step, init, jnp.swapaxes(gx_seq, 0, 1), reverse=reverse)
        return jnp.swapaxes(ys, 0, 1)

    fwd = run_dir(proj[..., :4 * H], packed['lstm_hh'][0], False)
    bwd = run_dir(proj[..., 4 * H:], packed['lstm_hh'][1], True)
    text_condition = jnp.concatenate([fwd, bwd], axis=-1)             # (B, T_text, emb)

    # --- Upsample: ConvTranspose1d(emb, emb, 60, stride=50, padding=5).
    #     The big (B*T_text, K_up*emb) matmul writes back bf16 (HBM-writeback bound);
    #     the overlap-add accumulates in f32.
    K_up, S, P = packed['upsample_k'], 50, 5
    contrib = mm_bias(text_condition.reshape(B * T_text, emb), packed['upsample_w_mat'],
                      jnp.zeros((K_up * emb,), jnp.float32), out_dtype=jnp.bfloat16,
                      vmem_limit=vmem_limit)
    contrib = contrib.reshape(B, T_text, K_up, emb).astype(jnp.float32)
    buf_len = T_text * S + S
    full = jnp.zeros((B, buf_len, emb), jnp.float32)
    full = full.at[:, :T_text * S, :].add(contrib[:, :, :S, :].reshape(B, T_text * S, emb))
    tail = jnp.pad(contrib[:, :, S:, :], ((0, 0), (0, 0), (0, S - (K_up - S)), (0, 0)))
    full = full.at[:, S:S + T_text * S, :].add(tail.reshape(B, T_text * S, emb))
    L = (T_text - 1) * S + K_up - 2 * P
    text_condition = full[:, P:P + L, :] + packed['upsample_b'][None, None, :]

    # --- spec regroup (exact torch transpose/unfold/permute/view semantics)
    z = _regroup_spec(spec, cfg['n_group'])                           # (B, L, n_group)
    assert z.shape[1] == L, (z.shape, L)

    # --- shared halo-padded bf16 condition reused by every flow's fused WN kernel
    #     (windows are fetched by in-kernel DMAs -> no duplicated HBM copies)
    tile_l, halo, n_t, l_pad = wn_tiling(L, wn_cfg['n_layers'], wn_cfg['kernel_size'],
                                         cfg.get('wn_tile_l', wn_tile_default))
    cond_pad = jnp.pad(text_condition,
                       ((0, 0), (halo, l_pad - L + halo), (0, 0))).astype(jnp.bfloat16)

    # --- flows
    output_spec, log_s_list, log_det_W_list = [], [], []
    for fk, flow in enumerate(packed['flows']):
        if fk % cfg['n_early_every'] == 0 and fk > 0:
            output_spec.append(z[:, :, :cfg['n_early_size']])
            z = z[:, :, cfg['n_early_size']:]
        # Invertible 1x1 conv (<= 8 channels -> plain XLA) + log determinant
        W = flow['invconv_w']
        z = jnp.einsum('blc,dc->bld', z, W)
        log_det_W_list.append(B * L * jnp.linalg.slogdet(W)[1])
        n_half = flow['n_half']
        z0, z1 = z[:, :, :n_half], z[:, :, n_half:]
        z1_new, log_s = wn_flow_coupling(flow['wn'], z0, z1, cond_pad, L,
                                         tile_l, halo, l_pad, gate_bf16, vmem_limit)
        log_s_list.append(jnp.transpose(log_s, (0, 2, 1)))            # (B, n_half, L)
        z = jnp.concatenate([z0, z1_new], axis=-1)
    output_spec.append(z)
    out = jnp.transpose(jnp.concatenate(output_spec, axis=-1), (0, 2, 1))
    return out, log_s_list, log_det_W_list


# ----------------------------------------------------------------------------
# Pure-JAX f32 reference (same eval-mode semantics) for the runtime self-check
# ----------------------------------------------------------------------------
def _ref_conv1d(x, w, b, dilation=1):
    K = w.shape[0]
    pad = dilation * (K - 1) // 2
    T = x.shape[1]
    xp = jnp.pad(x, ((0, 0), (pad, pad), (0, 0)))
    acc = jnp.zeros((x.shape[0], T, w.shape[2]), jnp.float32) + b
    for k in range(K):
        acc = acc + jnp.einsum('btc,cd->btd', xp[:, k * dilation:k * dilation + T], w[k])
    return acc


def _ref_conv_transpose1d(x, w, b, stride, padding):
    B, T, _ = x.shape
    K = w.shape[2]
    out = jnp.zeros((B, (T - 1) * stride + K, w.shape[1]), jnp.float32)
    for t in range(T):
        c = jnp.einsum('bc,cok->bko', x[:, t], w)
        out = out.at[:, t * stride:t * stride + K, :].add(c)
    L = (T - 1) * stride + K - 2 * padding
    return out[:, padding:padding + L, :] + b


def reference_forward(params, cfg, text_seq, spec):
    B = text_seq.shape[0]
    emb = cfg['encoder_embedding_dim']
    wn_cfg = cfg['WN_config']

    x = jnp.take(params['embedding'], text_seq, axis=0)
    for conv in params['enc_convs']:
        y = _ref_conv1d(x, conv['w'], conv['b']) / jnp.sqrt(1.0 + _BN_EPS)
        x = jnp.maximum(y, 0.0)

    H = emb // 2

    def run_dir(xseq, pr, reverse):
        def step(carry, xt):
            h, c = carry
            gates = xt @ pr['W_ih'].T + h @ pr['W_hh'].T + pr['b']
            i, f, g, o = jnp.split(gates, 4, axis=-1)
            c = jax.nn.sigmoid(f) * c + jax.nn.sigmoid(i) * jnp.tanh(g)
            h = jax.nn.sigmoid(o) * jnp.tanh(c)
            return (h, c), h
        init = (jnp.zeros((B, H), jnp.float32), jnp.zeros((B, H), jnp.float32))
        _, ys = jax.lax.scan(step, init, jnp.swapaxes(xseq, 0, 1), reverse=reverse)
        return jnp.swapaxes(ys, 0, 1)

    cond = jnp.concatenate([run_dir(x, params['lstm']['fwd'], False),
                            run_dir(x, params['lstm']['bwd'], True)], axis=-1)
    cond = _ref_conv_transpose1d(cond, params['upsample_w'], params['upsample_b'], 50, 5)

    z = _regroup_spec(spec, cfg['n_group'])
    L = z.shape[1]
    nc, nl = wn_cfg['n_channels'], wn_cfg['n_layers']

    outs, log_s_list, logdets = [], [], []
    for fk, flow in enumerate(params['flows']):
        if fk % cfg['n_early_every'] == 0 and fk > 0:
            outs.append(z[:, :, :cfg['n_early_size']])
            z = z[:, :, cfg['n_early_size']:]
        W = flow['invconv_w']
        z = jnp.einsum('blc,dc->bld', z, W)
        logdets.append(B * L * jnp.linalg.slogdet(W)[1])
        n_half = flow['n_half']
        z0, z1 = z[:, :, :n_half], z[:, :, n_half:]
        wn = flow['wn']
        h = jnp.einsum('blc,cd->bld', z0, wn['start_w']) + wn['start_b']
        skip = None
        for i in range(nl):
            in_act = (_ref_conv1d(h, wn['in_w'][i], wn['in_b'][i], dilation=2 ** i)
                      + jnp.einsum('blc,cd->bld', cond, wn['cond_w'][i]) + wn['cond_b'][i])
            acts = jnp.tanh(in_act[..., :nc]) * jax.nn.sigmoid(in_act[..., nc:])
            if i < nl - 1:
                h = jnp.einsum('blc,cd->bld', acts, wn['res_w'][i]) + wn['res_b'][i] + h
            s = jnp.einsum('blc,cd->bld', acts, wn['skip_w'][i]) + wn['skip_b'][i]
            skip = s if i == 0 else skip + s
        wn_out = jnp.einsum('blc,cd->bld', skip, wn['end_w']) + wn['end_b']
        b_aff, log_s = wn_out[..., :n_half], wn_out[..., n_half:]
        z1 = jnp.exp(log_s) * z1 + b_aff
        log_s_list.append(jnp.transpose(log_s, (0, 2, 1)))
        z = jnp.concatenate([z0, z1], axis=-1)
    outs.append(z)
    return jnp.transpose(jnp.concatenate(outs, axis=-1), (0, 2, 1)), log_s_list, logdets


# ----------------------------------------------------------------------------
if __name__ == "__main__":
    cfg = dict(
        n_symbols=20, symbols_embedding_dim=32, encoder_embedding_dim=32,
        encoder_n_convolutions=3, encoder_kernel_size=5,
        n_mel_channels=32, n_flows=4, n_group=8, n_early_every=2, n_early_size=2,
        WN_config=dict(n_layers=2, n_channels=16, kernel_size=3),
        wn_tile_l=64,   # small time tile so the toy run exercises the multi-tile halo path
    )
    key = jax.random.PRNGKey(0)
    pkey, dkey1, dkey2 = jax.random.split(key, 3)
    params = make_params(pkey, cfg)
    packed = pack_params(params, cfg)

    # Shapes: text time T=2 -> upsampled length 100; (n_mel/n_group)*frames = 4*25 = 100.
    B, T_text, frames = 2, 2, 25
    text_seq = jax.random.randint(dkey1, (B, T_text), 0, cfg['n_symbols'], dtype=jnp.int32)
    spec = jax.random.normal(dkey2, (B, cfg['n_mel_channels'], frames), dtype=jnp.float32)

    out, log_s_list, log_det_W_list = waveglow_forward(packed, cfg, text_seq, spec)
    jax.block_until_ready(out)
    for t in log_s_list + log_det_W_list:
        jax.block_until_ready(t)
    assert out.shape == (B, cfg['n_group'], 100), out.shape

    # Self-check against a pure-JAX f32 reference (loose tolerance: bf16 MXU inputs).
    ref_out, ref_log_s, ref_logdet = reference_forward(params, cfg, text_seq, spec)

    def check(a, b, name, atol=3e-2, rtol=3e-2):
        err = float(jnp.max(jnp.abs(jnp.asarray(a) - jnp.asarray(b))))
        lim = atol + rtol * float(jnp.max(jnp.abs(jnp.asarray(b))))
        assert err <= lim, (name, err, lim)

    check(out, ref_out, "out")
    for i, (a, b) in enumerate(zip(log_s_list, ref_log_s)):
        check(a, b, "log_s[%d]" % i)
    for i, (a, b) in enumerate(zip(log_det_W_list, ref_logdet)):
        check(a, b, "log_det_W[%d]" % i, atol=1e-4, rtol=1e-4)

    print("KERNEL_OK")
</pallas_src>

<mosaic_0001>
module attributes {stable_mosaic.version = 11 : i64} {
  func.func @_encoder_kernel(%arg0: i32, %arg1: i32, %arg2: memref<2x48x128xbf16, #tpu.memory_space<any>>, %arg3: memref<3x5x128x128xbf16, #tpu.memory_space<vmem>>, %arg4: memref<3x1x128xf32, #tpu.memory_space<vmem>>, %arg5: memref<3x1x128xf32, #tpu.memory_space<vmem>>, %arg6: memref<1x16x128xbf16, #tpu.memory_space<vmem>>, %arg7: memref<48x128xbf16, #tpu.memory_space<vmem>>, %arg8: memref<1x!tpu.dma_semaphore, #tpu.memory_space<semaphore_mem>>) attributes {dimension_semantics = [#tpu.dimension_semantics<parallel>, #tpu.dimension_semantics<parallel>], iteration_bounds = array<i64: 2, 1>, scalar_prefetch = 0 : i64, scratch_operands = 2 : i64, tpu.core_type = #tpu.core_type<tc>, window_params = [{}, {pipeline_mode = #tpu.pipeline_mode<synchronous>, transform_indices = @transform_1, window_bounds = array<i64: 3, 5, 128, 128>}, {pipeline_mode = #tpu.pipeline_mode<synchronous>, transform_indices = @transform_2, window_bounds = array<i64: 3, 1, 128>}, {pipeline_mode = #tpu.pipeline_mode<synchronous>, transform_indices = @transform_3, window_bounds = array<i64: 3, 1, 128>}, {transform_indices = @transform_4, window_bounds = array<i64: 1, 16, 128>}]} {
    %c16_i32 = arith.constant 16 : i32
    %0 = arith.muli %arg1, %c16_i32 : i32
    %1 = tpu.assume_multiple %0, 16 : i32
    %c0_i32 = arith.constant 0 : i32
    %c0_i32_0 = arith.constant 0 : i32
    %2 = tpu.memref_slice %arg2[%arg0, %1, %c0_i32_0] : memref<2x48x128xbf16, #tpu.memory_space<any>> -> memref<1x48x128xbf16, #tpu.memory_space<any>>
    %3 = tpu.memref_squeeze %2 : memref<1x48x128xbf16, #tpu.memory_space<any>> -> memref<48x128xbf16, #tpu.memory_space<any>>
    %4 = tpu.memref_slice %arg8[%c0_i32] : memref<1x!tpu.dma_semaphore, #tpu.memory_space<semaphore_mem>> -> memref<1x!tpu.dma_semaphore, #tpu.memory_space<semaphore_mem>>
    %5 = tpu.memref_squeeze %4 : memref<1x!tpu.dma_semaphore, #tpu.memory_space<semaphore_mem>> -> memref<!tpu.dma_semaphore, #tpu.memory_space<semaphore_mem>>
    tpu.enqueue_dma source(%3 : memref<48x128xbf16, #tpu.memory_space<any>>) target(%arg7 : memref<48x128xbf16, #tpu.memory_space<vmem>>) target_semaphore(%5 : memref<!tpu.dma_semaphore, #tpu.memory_space<semaphore_mem>>)
    %c0_i32_1 = arith.constant 0 : i32
    %c0_i32_2 = arith.constant 0 : i32
    %6 = tpu.memref_slice %arg2[%arg0, %1, %c0_i32_2] : memref<2x48x128xbf16, #tpu.memory_space<any>> -> memref<1x48x128xbf16, #tpu.memory_space<any>>
    %7 = tpu.memref_squeeze %6 : memref<1x48x128xbf16, #tpu.memory_space<any>> -> memref<48x128xbf16, #tpu.memory_space<any>>
    %8 = tpu.memref_slice %arg8[%c0_i32_1] : memref<1x!tpu.dma_semaphore, #tpu.memory_space<semaphore_mem>> -> memref<1x!tpu.dma_semaphore, #tpu.memory_space<semaphore_mem>>
    %9 = tpu.memref_squeeze %8 : memref<1x!tpu.dma_semaphore, #tpu.memory_space<semaphore_mem>> -> memref<!tpu.dma_semaphore, #tpu.memory_space<semaphore_mem>>
    tpu.wait_dma2 semaphore(%9 : memref<!tpu.dma_semaphore, #tpu.memory_space<semaphore_mem>>) src(%7 : memref<48x128xbf16, #tpu.memory_space<any>>) dst(%arg7 : memref<48x128xbf16, #tpu.memory_space<vmem>>)
    %10 = tpu.iota {dimensions = array<i32: 0>} : vector<48x1xi32>
    %c16_i32_3 = arith.constant 16 : i32
    %11 = arith.subi %1, %c16_i32_3 : i32
    %12 = vector.broadcast %11 : i32 to vector<48x1xi32>
    %13 = arith.addi %12, %10 : vector<48x1xi32>
    %c0_i32_4 = arith.constant 0 : i32
    %14 = vector.broadcast %c0_i32_4 : i32 to vector<48x1xi32>
    %15 = arith.cmpi sge, %13, %14 : vector<48x1xi32>
    %c2_i32 = arith.constant 2 : i32
    %16 = vector.broadcast %c2_i32 : i32 to vector<48x1xi32>
    %17 = arith.cmpi slt, %13, %16 : vector<48x1xi32>
    %18 = arith.andi %15, %17 : vector<48x1xi1>
    %c0 = arith.constant 0 : index
    %c0_5 = arith.constant 0 : index
    %19 = vector.load %arg7[%c0, %c0_5] : memref<48x128xbf16, #tpu.memory_space<vmem>>, vector<48x128xbf16>
    %cst = arith.constant 0.000000e+00 : f32
    %20 = vector.broadcast %cst : f32 to vector<44x128xf32>
    %21 = vector.extract_strided_slice %19 {offsets = [0, 0], sizes = [44, 128], strides = [1, 1]} : vector<48x128xbf16> to vector<44x128xbf16>
    %c0_6 = arith.constant 0 : index
    %c0_7 = arith.constant 0 : index
    %c0_8 = arith.constant 0 : index
    %c0_9 = arith.constant 0 : index
    %22 = vector.load %arg3[%c0_6, %c0_7, %c0_8, %c0_9] : memref<3x5x128x128xbf16, #tpu.memory_space<vmem>>, vector<1x1x128x128xbf16>
    %23 = vector.shape_cast %22 : vector<1x1x128x128xbf16> to vector<128x128xbf16>
    %cst_10 = arith.constant dense<0.000000e+00> : vector<44x128xf32>
    %24 = tpu.matmul %21, %23, %cst_10 {dimension_numbers = #tpu.dot_dimension_numbers<[1], [0], [0], [1], [0, 0, 1, 1], [], []>} : vector<44x128xbf16>, vector<128x128xbf16>, vector<44x128xf32> -> vector<44x128xf32>
    %25 = arith.addf %20, %24 : vector<44x128xf32>
    %26 = vector.extract_strided_slice %19 {offsets = [1, 0], sizes = [44, 128], strides = [1, 1]} : vector<48x128xbf16> to vector<44x128xbf16>
    %c0_11 = arith.constant 0 : index
    %c1 = arith.constant 1 : index
    %c0_12 = arith.constant 0 : index
    %c0_13 = arith.constant 0 : index
    %27 = vector.load %arg3[%c0_11, %c1, %c0_12, %c0_13] : memref<3x5x128x128xbf16, #tpu.memory_space<vmem>>, vector<1x1x128x128xbf16>
    %28 = vector.shape_cast %27 : vector<1x1x128x128xbf16> to vector<128x128xbf16>
    %cst_14 = arith.constant dense<0.000000e+00> : vector<44x128xf32>
    %29 = tpu.matmul %26, %28, %cst_14 {dimension_numbers = #tpu.dot_dimension_numbers<[1], [0], [0], [1], [0, 0, 1, 1], [], []>} : vector<44x128xbf16>, vector<128x128xbf16>, vector<44x128xf32> -> vector<44x128xf32>
    %30 = arith.addf %25, %29 : vector<44x128xf32>
    %31 = vector.extract_strided_slice %19 {offsets = [2, 0], sizes = [44, 128], strides = [1, 1]} : vector<48x128xbf16> to vector<44x128xbf16>
    %c0_15 = arith.constant 0 : index
    %c2 = arith.constant 2 : index
    %c0_16 = arith.constant 0 : index
    %c0_17 = arith.constant 0 : index
    %32 = vector.load %arg3[%c0_15, %c2, %c0_16, %c0_17] : memref<3x5x128x128xbf16, #tpu.memory_space<vmem>>, vector<1x1x128x128xbf16>
    %33 = vector.shape_cast %32 : vector<1x1x128x128xbf16> to vector<128x128xbf16>
    %cst_18 = arith.constant dense<0.000000e+00> : vector<44x128xf32>
    %34 = tpu.matmul %31, %33, %cst_18 {dimension_numbers = #tpu.dot_dimension_numbers<[1], [0], [0], [1], [0, 0, 1, 1], [], []>} : vector<44x128xbf16>, vector<128x128xbf16>, vector<44x128xf32> -> vector<44x128xf32>
    %35 = arith.addf %30, %34 : vector<44x128xf32>
    %36 = vector.extract_strided_slice %19 {offsets = [3, 0], sizes = [44, 128], strides = [1, 1]} : vector<48x128xbf16> to vector<44x128xbf16>
    %c0_19 = arith.constant 0 : index
    %c3 = arith.constant 3 : index
    %c0_20 = arith.constant 0 : index
    %c0_21 = arith.constant 0 : index
    %37 = vector.load %arg3[%c0_19, %c3, %c0_20, %c0_21] : memref<3x5x128x128xbf16, #tpu.memory_space<vmem>>, vector<1x1x128x128xbf16>
    %38 = vector.shape_cast %37 : vector<1x1x128x128xbf16> to vector<128x128xbf16>
    %cst_22 = arith.constant dense<0.000000e+00> : vector<44x128xf32>
    %39 = tpu.matmul %36, %38, %cst_22 {dimension_numbers = #tpu.dot_dimension_numbers<[1], [0], [0], [1], [0, 0, 1, 1], [], []>} : vector<44x128xbf16>, vector<128x128xbf16>, vector<44x128xf32> -> vector<44x128xf32>
    %40 = arith.addf %35, %39 : vector<44x128xf32>
    %41 = vector.extract_strided_slice %19 {offsets = [4, 0], sizes = [44, 128], strides = [1, 1]} : vector<48x128xbf16> to vector<44x128xbf16>
    %c0_23 = arith.constant 0 : index
    %c4 = arith.constant 4 : index
    %c0_24 = arith.constant 0 : index
    %c0_25 = arith.constant 0 : index
    %42 = vector.load %arg3[%c0_23, %c4, %c0_24, %c0_25] : memref<3x5x128x128xbf16, #tpu.memory_space<vmem>>, vector<1x1x128x128xbf16>
    %43 = vector.shape_cast %42 : vector<1x1x128x128xbf16> to vector<128x128xbf16>
    %cst_26 = arith.constant dense<0.000000e+00> : vector<44x128xf32>
    %44 = tpu.matmul %41, %43, %cst_26 {dimension_numbers = #tpu.dot_dimension_numbers<[1], [0], [0], [1], [0, 0, 1, 1], [], []>} : vector<44x128xbf16>, vector<128x128xbf16>, vector<44x128xf32> -> vector<44x128xf32>
    %45 = arith.addf %40, %44 : vector<44x128xf32>
    %c0_27 = arith.constant 0 : index
    %c0_28 = arith.constant 0 : index
    %c0_29 = arith.constant 0 : index
    %46 = vector.load %arg4[%c0_27, %c0_28, %c0_29] : memref<3x1x128xf32, #tpu.memory_space<vmem>>, vector<1x1x128xf32>
    %47 = vector.shape_cast %46 : vector<1x1x128xf32> to vector<1x128xf32>
    %48 = vector.broadcast %47 : vector<1x128xf32> to vector<44x128xf32>
    %49 = arith.mulf %45, %48 : vector<44x128xf32>
    %c0_30 = arith.constant 0 : index
    %c0_31 = arith.constant 0 : index
    %c0_32 = arith.constant 0 : index
    %50 = vector.load %arg5[%c0_30, %c0_31, %c0_32] : memref<3x1x128xf32, #tpu.memory_space<vmem>>, vector<1x1x128xf32>
    %51 = vector.shape_cast %50 : vector<1x1x128xf32> to vector<1x128xf32>
    %52 = vector.broadcast %51 : vector<1x128xf32> to vector<44x128xf32>
    %53 = arith.addf %49, %52 : vector<44x128xf32>
    %cst_33 = arith.constant 0.000000e+00 : f32
    %54 = vector.broadcast %cst_33 : f32 to vector<44x128xf32>
    %55 = arith.maximumf %53, %54 : vector<44x128xf32>
    %56 = vector.extract_strided_slice %18 {offsets = [2, 0], sizes = [44, 1], strides = [1, 1]} : vector<48x1xi1> to vector<44x1xi1>
    %cst_34 = arith.constant 0.000000e+00 : f32
    %57 = vector.shape_cast %56 : vector<44x1xi1> to vector<44x1xi1>
    %58 = vector.broadcast %57 : vector<44x1xi1> to vector<44x128xi1>
    %59 = vector.broadcast %cst_34 : f32 to vector<44x128xf32>
    %60 = arith.select %58, %55, %59 : vector<44x128xi1>, vector<44x128xf32>
    %61 = arith.truncf %60 : vector<44x128xf32> to vector<44x128xbf16>
    %cst_35 = arith.constant 0.000000e+00 : f32
    %62 = vector.broadcast %cst_35 : f32 to vector<40x128xf32>
    %63 = vector.extract_strided_slice %61 {offsets = [0, 0], sizes = [40, 128], strides = [1, 1]} : vector<44x128xbf16> to vector<40x128xbf16>
    %c1_36 = arith.constant 1 : index
    %c0_37 = arith.constant 0 : index
    %c0_38 = arith.constant 0 : index
    %c0_39 = arith.constant 0 : index
    %64 = vector.load %arg3[%c1_36, %c0_37, %c0_38, %c0_39] : memref<3x5x128x128xbf16, #tpu.memory_space<vmem>>, vector<1x1x128x128xbf16>
    %65 = vector.shape_cast %64 : vector<1x1x128x128xbf16> to vector<128x128xbf16>
    %cst_40 = arith.constant dense<0.000000e+00> : vector<40x128xf32>
    %66 = tpu.matmul %63, %65, %cst_40 {dimension_numbers = #tpu.dot_dimension_numbers<[1], [0], [0], [1], [0, 0, 1, 1], [], []>} : vector<40x128xbf16>, vector<128x128xbf16>, vector<40x128xf32> -> vector<40x128xf32>
    %67 = arith.addf %62, %66 : vector<40x128xf32>
    %68 = vector.extract_strided_slice %61 {offsets = [1, 0], sizes = [40, 128], strides = [1, 1]} : vector<44x128xbf16> to vector<40x128xbf16>
    %c1_41 = arith.constant 1 : index
    %c1_42 = arith.constant 1 : index
    %c0_43 = arith.constant 0 : index
    %c0_44 = arith.constant 0 : index
    %69 = vector.load %arg3[%c1_41, %c1_42, %c0_43, %c0_44] : memref<3x5x128x128xbf16, #tpu.memory_space<vmem>>, vector<1x1x128x128xbf16>
    %70 = vector.shape_cast %69 : vector<1x1x128x128xbf16> to vector<128x128xbf16>
    %cst_45 = arith.constant dense<0.000000e+00> : vector<40x128xf32>
    %71 = tpu.matmul %68, %70, %cst_45 {dimension_numbers = #tpu.dot_dimension_numbers<[1], [0], [0], [1], [0, 0, 1, 1], [], []>} : vector<40x128xbf16>, vector<128x128xbf16>, vector<40x128xf32> -> vector<40x128xf32>
    %72 = arith.addf %67, %71 : vector<40x128xf32>
    %73 = vector.extract_strided_slice %61 {offsets = [2, 0], sizes = [40, 128], strides = [1, 1]} : vector<44x128xbf16> to vector<40x128xbf16>
    %c1_46 = arith.constant 1 : index
    %c2_47 = arith.constant 2 : index
    %c0_48 = arith.constant 0 : index
    %c0_49 = arith.constant 0 : index
    %74 = vector.load %arg3[%c1_46, %c2_47, %c0_48, %c0_49] : memref<3x5x128x128xbf16, #tpu.memory_space<vmem>>, vector<1x1x128x128xbf16>
    %75 = vector.shape_cast %74 : vector<1x1x128x128xbf16> to vector<128x128xbf16>
    %cst_50 = arith.constant dense<0.000000e+00> : vector<40x128xf32>
    %76 = tpu.matmul %73, %75, %cst_50 {dimension_numbers = #tpu.dot_dimension_numbers<[1], [0], [0], [1], [0, 0, 1, 1], [], []>} : vector<40x128xbf16>, vector<128x128xbf16>, vector<40x128xf32> -> vector<40x128xf32>
    %77 = arith.addf %72, %76 : vector<40x128xf32>
    %78 = vector.extract_strided_slice %61 {offsets = [3, 0], sizes = [40, 128], strides = [1, 1]} : vector<44x128xbf16> to vector<40x128xbf16>
    %c1_51 = arith.constant 1 : index
    %c3_52 = arith.constant 3 : index
    %c0_53 = arith.constant 0 : index
    %c0_54 = arith.constant 0 : index
    %79 = vector.load %arg3[%c1_51, %c3_52, %c0_53, %c0_54] : memref<3x5x128x128xbf16, #tpu.memory_space<vmem>>, vector<1x1x128x128xbf16>
    %80 = vector.shape_cast %79 : vector<1x1x128x128xbf16> to vector<128x128xbf16>
    %cst_55 = arith.constant dense<0.000000e+00> : vector<40x128xf32>
    %81 = tpu.matmul %78, %80, %cst_55 {dimension_numbers = #tpu.dot_dimension_numbers<[1], [0], [0], [1], [0, 0, 1, 1], [], []>} : vector<40x128xbf16>, vector<128x128xbf16>, vector<40x128xf32> -> vector<40x128xf32>
    %82 = arith.addf %77, %81 : vector<40x128xf32>
    %83 = vector.extract_strided_slice %61 {offsets = [4, 0], sizes = [40, 128], strides = [1, 1]} : vector<44x128xbf16> to vector<40x128xbf16>
    %c1_56 = arith.constant 1 : index
    %c4_57 = arith.constant 4 : index
    %c0_58 = arith.constant 0 : index
    %c0_59 = arith.constant 0 : index
    %84 = vector.load %arg3[%c1_56, %c4_57, %c0_58, %c0_59] : memref<3x5x128x128xbf16, #tpu.memory_space<vmem>>, vector<1x1x128x128xbf16>
    %85 = vector.shape_cast %84 : vector<1x1x128x128xbf16> to vector<128x128xbf16>
    %cst_60 = arith.constant dense<0.000000e+00> : vector<40x128xf32>
    %86 = tpu.matmul %83, %85, %cst_60 {dimension_numbers = #tpu.dot_dimension_numbers<[1], [0], [0], [1], [0, 0, 1, 1], [], []>} : vector<40x128xbf16>, vector<128x128xbf16>, vector<40x128xf32> -> vector<40x128xf32>
    %87 = arith.addf %82, %86 : vector<40x128xf32>
    %c1_61 = arith.constant 1 : index
    %c0_62 = arith.constant 0 : index
    %c0_63 = arith.constant 0 : index
    %88 = vector.load %arg4[%c1_61, %c0_62, %c0_63] : memref<3x1x128xf32, #tpu.memory_space<vmem>>, vector<1x1x128xf32>
    %89 = vector.shape_cast %88 : vector<1x1x128xf32> to vector<1x128xf32>
    %90 = vector.broadcast %89 : vector<1x128xf32> to vector<40x128xf32>
    %91 = arith.mulf %87, %90 : vector<40x128xf32>
    %c1_64 = arith.constant 1 : index
    %c0_65 = arith.constant 0 : index
    %c0_66 = arith.constant 0 : index
    %92 = vector.load %arg5[%c1_64, %c0_65, %c0_66] : memref<3x1x128xf32, #tpu.memory_space<vmem>>, vector<1x1x128xf32>
    %93 = vector.shape_cast %92 : vector<1x1x128xf32> to vector<1x128xf32>
    %94 = vector.broadcast %93 : vector<1x128xf32> to vector<40x128xf32>
    %95 = arith.addf %91, %94 : vector<40x128xf32>
    %cst_67 = arith.constant 0.000000e+00 : f32
    %96 = vector.broadcast %cst_67 : f32 to vector<40x128xf32>
    %97 = arith.maximumf %95, %96 : vector<40x128xf32>
    %98 = vector.extract_strided_slice %18 {offsets = [4, 0], sizes = [40, 1], strides = [1, 1]} : vector<48x1xi1> to vector<40x1xi1>
    %cst_68 = arith.constant 0.000000e+00 : f32
    %99 = vector.shape_cast %98 : vector<40x1xi1> to vector<40x1xi1>
    %100 = vector.broadcast %99 : vector<40x1xi1> to vector<40x128xi1>
    %101 = vector.broadcast %cst_68 : f32 to vector<40x128xf32>
    %102 = arith.select %100, %97, %101 : vector<40x128xi1>, vector<40x128xf32>
    %103 = arith.truncf %102 : vector<40x128xf32> to vector<40x128xbf16>
    %cst_69 = arith.constant 0.000000e+00 : f32
    %104 = vector.broadcast %cst_69 : f32 to vector<36x128xf32>
    %105 = vector.extract_strided_slice %103 {offsets = [0, 0], sizes = [36, 128], strides = [1, 1]} : vector<40x128xbf16> to vector<36x128xbf16>
    %c2_70 = arith.constant 2 : index
    %c0_71 = arith.constant 0 : index
    %c0_72 = arith.constant 0 : index
    %c0_73 = arith.constant 0 : index
    %106 = vector.load %arg3[%c2_70, %c0_71, %c0_72, %c0_73] : memref<3x5x128x128xbf16, #tpu.memory_space<vmem>>, vector<1x1x128x128xbf16>
    %107 = vector.shape_cast %106 : vector<1x1x128x128xbf16> to vector<128x128xbf16>
    %cst_74 = arith.constant dense<0.000000e+00> : vector<36x128xf32>
    %108 = tpu.matmul %105, %107, %cst_74 {dimension_numbers = #tpu.dot_dimension_numbers<[1], [0], [0], [1], [0, 0, 1, 1], [], []>} : vector<36x128xbf16>, vector<128x128xbf16>, vector<36x128xf32> -> vector<36x128xf32>
    %109 = arith.addf %104, %108 : vector<36x128xf32>
    %110 = vector.extract_strided_slice %103 {offsets = [1, 0], sizes = [36, 128], strides = [1, 1]} : vector<40x128xbf16> to vector<36x128xbf16>
    %c2_75 = arith.constant 2 : index
    %c1_76 = arith.constant 1 : index
    %c0_77 = arith.constant 0 : index
    %c0_78 = arith.constant 0 : index
    %111 = vector.load %arg3[%c2_75, %c1_76, %c0_77, %c0_78] : memref<3x5x128x128xbf16, #tpu.memory_space<vmem>>, vector<1x1x128x128xbf16>
    %112 = vector.shape_cast %111 : vector<1x1x128x128xbf16> to vector<128x128xbf16>
    %cst_79 = arith.constant dense<0.000000e+00> : vector<36x128xf32>
    %113 = tpu.matmul %110, %112, %cst_79 {dimension_numbers = #tpu.dot_dimension_numbers<[1], [0], [0], [1], [0, 0, 1, 1], [], []>} : vector<36x128xbf16>, vector<128x128xbf16>, vector<36x128xf32> -> vector<36x128xf32>
    %114 = arith.addf %109, %113 : vector<36x128xf32>
    %115 = vector.extract_strided_slice %103 {offsets = [2, 0], sizes = [36, 128], strides = [1, 1]} : vector<40x128xbf16> to vector<36x128xbf16>
    %c2_80 = arith.constant 2 : index
    %c2_81 = arith.constant 2 : index
    %c0_82 = arith.constant 0 : index
    %c0_83 = arith.constant 0 : index
    %116 = vector.load %arg3[%c2_80, %c2_81, %c0_82, %c0_83] : memref<3x5x128x128xbf16, #tpu.memory_space<vmem>>, vector<1x1x128x128xbf16>
    %117 = vector.shape_cast %116 : vector<1x1x128x128xbf16> to vector<128x128xbf16>
    %cst_84 = arith.constant dense<0.000000e+00> : vector<36x128xf32>
    %118 = tpu.matmul %115, %117, %cst_84 {dimension_numbers = #tpu.dot_dimension_numbers<[1], [0], [0], [1], [0, 0, 1, 1], [], []>} : vector<36x128xbf16>, vector<128x128xbf16>, vector<36x128xf32> -> vector<36x128xf32>
    %119 = arith.addf %114, %118 : vector<36x128xf32>
    %120 = vector.extract_strided_slice %103 {offsets = [3, 0], sizes = [36, 128], strides = [1, 1]} : vector<40x128xbf16> to vector<36x128xbf16>
    %c2_85 = arith.constant 2 : index
    %c3_86 = arith.constant 3 : index
    %c0_87 = arith.constant 0 : index
    %c0_88 = arith.constant 0 : index
    %121 = vector.load %arg3[%c2_85, %c3_86, %c0_87, %c0_88] : memref<3x5x128x128xbf16, #tpu.memory_space<vmem>>, vector<1x1x128x128xbf16>
    %122 = vector.shape_cast %121 : vector<1x1x128x128xbf16> to vector<128x128xbf16>
    %cst_89 = arith.constant dense<0.000000e+00> : vector<36x128xf32>
    %123 = tpu.matmul %120, %122, %cst_89 {dimension_numbers = #tpu.dot_dimension_numbers<[1], [0], [0], [1], [0, 0, 1, 1], [], []>} : vector<36x128xbf16>, vector<128x128xbf16>, vector<36x128xf32> -> vector<36x128xf32>
    %124 = arith.addf %119, %123 : vector<36x128xf32>
    %125 = vector.extract_strided_slice %103 {offsets = [4, 0], sizes = [36, 128], strides = [1, 1]} : vector<40x128xbf16> to vector<36x128xbf16>
    %c2_90 = arith.constant 2 : index
    %c4_91 = arith.constant 4 : index
    %c0_92 = arith.constant 0 : index
    %c0_93 = arith.constant 0 : index
    %126 = vector.load %arg3[%c2_90, %c4_91, %c0_92, %c0_93] : memref<3x5x128x128xbf16, #tpu.memory_space<vmem>>, vector<1x1x128x128xbf16>
    %127 = vector.shape_cast %126 : vector<1x1x128x128xbf16> to vector<128x128xbf16>
    %cst_94 = arith.constant dense<0.000000e+00> : vector<36x128xf32>
    %128 = tpu.matmul %125, %127, %cst_94 {dimension_numbers = #tpu.dot_dimension_numbers<[1], [0], [0], [1], [0, 0, 1, 1], [], []>} : vector<36x128xbf16>, vector<128x128xbf16>, vector<36x128xf32> -> vector<36x128xf32>
    %129 = arith.addf %124, %128 : vector<36x128xf32>
    %c2_95 = arith.constant 2 : index
    %c0_96 = arith.constant 0 : index
    %c0_97 = arith.constant 0 : index
    %130 = vector.load %arg4[%c2_95, %c0_96, %c0_97] : memref<3x1x128xf32, #tpu.memory_space<vmem>>, vector<1x1x128xf32>
    %131 = vector.shape_cast %130 : vector<1x1x128xf32> to vector<1x128xf32>
    %132 = vector.broadcast %131 : vector<1x128xf32> to vector<36x128xf32>
    %133 = arith.mulf %129, %132 : vector<36x128xf32>
    %c2_98 = arith.constant 2 : index
    %c0_99 = arith.constant 0 : index
    %c0_100 = arith.constant 0 : index
    %134 = vector.load %arg5[%c2_98, %c0_99, %c0_100] : memref<3x1x128xf32, #tpu.memory_space<vmem>>, vector<1x1x128xf32>
    %135 = vector.shape_cast %134 : vector<1x1x128xf32> to vector<1x128xf32>
    %136 = vector.broadcast %135 : vector<1x128xf32> to vector<36x128xf32>
    %137 = arith.addf %133, %136 : vector<36x128xf32>
    %cst_101 = arith.constant 0.000000e+00 : f32
    %138 = vector.broadcast %cst_101 : f32 to vector<36x128xf32>
    %139 = arith.maximumf %137, %138 : vector<36x128xf32>
    %140 = vector.extract_strided_slice %18 {offsets = [6, 0], sizes = [36, 1], strides = [1, 1]} : vector<48x1xi1> to vector<36x1xi1>
    %cst_102 = arith.constant 0.000000e+00 : f32
    %141 = vector.shape_cast %140 : vector<36x1xi1> to vector<36x1xi1>
    %142 = vector.broadcast %141 : vector<36x1xi1> to vector<36x128xi1>
    %143 = vector.broadcast %cst_102 : f32 to vector<36x128xf32>
    %144 = arith.select %142, %139, %143 : vector<36x128xi1>, vector<36x128xf32>
    %145 = vector.extract_strided_slice %144 {offsets = [10, 0], sizes = [16, 128], strides = [1, 1]} : vector<36x128xf32> to vector<16x128xf32>
    %146 = arith.truncf %145 : vector<16x128xf32> to vector<16x128xbf16>
    %c0_103 = arith.constant 0 : index
    %c0_104 = arith.constant 0 : index
    %c0_105 = arith.constant 0 : index
    %147 = vector.load %arg6[%c0_103, %c0_104, %c0_105] : memref<1x16x128xbf16, #tpu.memory_space<vmem>>, vector<1x16x128xbf16>
    %148 = vector.shape_cast %147 : vector<1x16x128xbf16> to vector<16x128xbf16>
    %149 = vector.shape_cast %146 : vector<16x128xbf16> to vector<1x16x128xbf16>
    tpu.vector_store %arg6[%c0_103, %c0_104, %c0_105], %149 {strides = array<i32>} : memref<1x16x128xbf16, #tpu.memory_space<vmem>>, vector<1x16x128xbf16>,
    return
  }
  func.func @transform_1(%arg0: i32, %arg1: i32) -> (i32, i32, i32, i32) {
    %c0_i32 = arith.constant 0 : i32
    %c0_i32_0 = arith.constant 0 : i32
    %c0_i32_1 = arith.constant 0 : i32
    %c0_i32_2 = arith.constant 0 : i32
    %c0_i32_3 = arith.constant 0 : i32
    return %c0_i32, %c0_i32_0, %c0_i32_1, %c0_i32_2 : i32, i32, i32, i32
  }
  func.func @transform_2(%arg0: i32, %arg1: i32) -> (i32, i32, i32) {
    %c0_i32 = arith.constant 0 : i32
    %c0_i32_0 = arith.constant 0 : i32
    %c0_i32_1 = arith.constant 0 : i32
    %c0_i32_2 = arith.constant 0 : i32
    return %c0_i32, %c0_i32_0, %c0_i32_1 : i32, i32, i32
  }
  func.func @transform_3(%arg0: i32, %arg1: i32) -> (i32, i32, i32) {
    %c0_i32 = arith.constant 0 : i32
    %c0_i32_0 = arith.constant 0 : i32
    %c0_i32_1 = arith.constant 0 : i32
    %c0_i32_2 = arith.constant 0 : i32
    return %c0_i32, %c0_i32_0, %c0_i32_1 : i32, i32, i32
  }
  func.func @transform_4(%arg0: i32, %arg1: i32) -> (i32, i32, i32) {
    %c0_i32 = arith.constant 0 : i32
    %c0_i32_0 = arith.constant 0 : i32
    return %arg0, %arg1, %c0_i32 : i32, i32, i32
  }
}

</mosaic_0001>

<bundles_post_ra>
// kernel: tpu_custom_call.1
= control target key start
LH: loop header
LB: loop body
LE: loop exit
PB: predicated region body
PF: predicated region fallthrough
CT: control target
= control target key end

     0   :  { %9 = vsyncpa [#allocation5], 0  ;;  %s4373_s0 = inlined_call_operand.hbm [shape: bf16[2,48,128], index: 0, kind: input, shape index: {}]   ;;  %s4374_s1 = inlined_call_operand.hbm [shape: bf16[3,5,128,128], index: 1, kind: input, shape index: {}]   ;;  %s4375_s2 = inlined_call_operand.vmem [shape: f32[3,1,128], index: 2, kind: input, shape index: {}]   ;;  %s4376_s3 = inlined_call_operand.vmem [shape: f32[3,1,128], index: 3, kind: input, shape index: {}]   ;;  %s4377_s4 = inlined_call_operand.hbm [shape: bf16[2,16,128], index: 4, kind: output, shape index: {}]  }
   0x1   :  { %10 = vsyncpa [#allocation6], 0 }
   0x2   :  { %12 = vsyncpa [#allocation6 + $0x1], 0  ;;  %s3793_s15 = smov 0   ;;  %s3795_s16 = smov 0  }
   0x3   :  { %s3797_s17 = smov 0   ;;  %s3799_s18 = smov 0  }
   0x4   :  { %s3801_s19 = smov 0   ;;  %s3803_s20 = smov 0  }
   0x5 LB: > { %s2582_s21 = sadd.s32 4294967295, %s3755_s20   ;;  %s2583_s22 = sadd.s32 4294967294, %s3755_s20   ;;  %s3755_s20 = sphi %s3803_s20, %s18_s20   ;;  %s3751_s19 = sphi %s3801_s19, %s4395_s19   ;;  %s3747_s18 = sphi %s3799_s18, %s4394_s18   ;;  %s3743_s17 = sphi %s3797_s17, %s4393_s17   ;;  %s3739_s16 = sphi %s3795_s16, %s4392_s16   ;;  %s3735_s15 = sphi %s3793_s15, %s4391_s15  }
   0x6   : > { %s30_s23 = sadd.s32 1, %s3751_s19  ;;  %s102_s24 = sadd.s32 1, %s3743_s17 }
   0x7   : > { %p32_p0 = scmp.ge.s32.totalorder %s30_s23, 2  ;;  %p112_p1 = scmp.ne.s32.totalorder %s3743_s17, %s3739_s16 }
   0x8   : > { %p113_p2 = scmp.eq.s32.totalorder %s2582_s21, 1  ;;  %p118_p3 = scmp.ne.s32.totalorder %s3739_s16, %s3735_s15 }
   0x9   : > { %s4397_s23 = smov (%p32_p0, %s30_s23), 0  ;;  %p119_p5 = scmp.eq.s32.totalorder %s2583_s22, 1 }
   0xa   : > { %p3833_p4 = por %p113_p2, %p112_p1  ;;  %s97_s26 = ssub.s32 %s3751_s19, %s4397_s23 }
   0xb   : > { %p2584_p6 = scmp.ge.s32.totalorder %s3755_s20, 1  ;;  %p100_p7 = scmp.eq.s32.totalorder %s97_s26, 0 }
   0xc   : > { %s4382_s25 = scalar_select %p3833_p4, 1, 0 }
   0xd   : > { %p3840_p8 = por %p119_p5, %p118_p3  ;;  %p126_p9 = scmp.lt.s32.totalorder %s3755_s20, 3 }
   0xe   : > { %s3846_s28 = scalar_select %p100_p7, %s3743_s17, %s102_s24  }
   0xf   : > { %s4383_s27 = scalar_select %p3840_p8, 1, 0 }
  0x10   : > { %p3848_p10 = pnand %p2584_p6, %p126_p9  ;;  %p3852_p11 = scmp.eq.s32.totalorder %s2582_s21, 0 }
  0x11   : > { %s3757_s5 = smov [#allocation4]   ;;  %s3619_s10 = scalar_lea.hbm %s4374_s1, 15360 }
  0x12   : > { %s4384_s29 = scalar_select %p3848_p10, 1, 0 }
  0x13   : > { %s4385_s30 = scalar_select %p3852_p11, 1, 0 }
  0x14   : > { %p3430_p12 = pneg %p3848_p10  ;;  %s138_s6 = sshll.u32 %s3757_s5, 4  ;;  %s139_s6 = int_to_ptr.vmem [resolvable:$true] %s138_s6 }
  0x15   : > { %p3620_p0 = scmp.ne.s32.totalorder %s4374_s1, %s3619_s10  ;;  %p3626_p5 = scmp.lt.u32.totalorder %s3619_s10, %s4374_s1 }
  0x16   : > { %p3860_p13 = pnand %p3852_p11, %p3430_p12 }
  0x18   : > { %p3621_p1 = pneg %p3860_p13 }
  0x1a   : > { %p3622_p2 = pnand %p3621_p1, %p3620_p0 }
  0x1c   : > { %p3623_p3 = pneg %p3622_p2 }
  0x1e   : > { %p3628_p6 = pnand %p3626_p5, %p3623_p3 }
  0x20   : > { %3631 = shalt.err (!%p3628_p6)
}
  0x21   : > { %s3632_s21 = scalar_lea.vmem %s139_s6, 15360  ;;  %p3640_p8 = scmp.lt.s32.totalorder %s139_s6, %s139_s6 }
  0x22   : > { %p3633_p7 = scmp.ne.s32.totalorder %s139_s6, %s3632_s21  ;;  %p3641_p4 = scmp.lt.s32.totalorder %s3632_s21, %s3632_s21 }
  0x24   : > { %p3635_p9 = pnand %p3633_p7, %p3621_p1  ;;  %p3642_p11 = por %p3641_p4, %p3640_p8 }
  0x26   : > { %p3636_p12 = pneg %p3635_p9 }
  0x28   : > { %p3643_p10 = pnand %p3642_p11, %p3636_p12 }
  0x2a   : > { %3646 = shalt.err (!%p3643_p10)
}
  0x2b   : > { %s3758_s22 = smov 64   ;;  %s3759_s24 = smov 4  }
  0x2c   : > { %3433 = dma.hbm_to_vmem [thread:$0]  (!%p3860_p13), %s4374_s1, 15360, %s139_s6, [#allocation5], %s3758_s22, %s3758_s22, %s3759_s24  }
  0x2d   : > { %p4387_p0 = scmp.ne.s32.totalorder %s4384_s29, 0 }
  0x2e   : > { %p4388_p2 = scmp.ne.s32.totalorder (!%p4387_p0), %s4385_s30, 0 }
  0x2f   : > { %160 = sbr.rel (%p4387_p0) target bundleno = 1155 (0x483), region = 32 }
  0x36   : > { %3724 = dma.done.wait (%p4388_p2), [#allocation5], 15360  }
  0x37   : > { %3726 = vsyncadd (%p4388_p2), [#allocation5], 4294951936  ;;  %s176_s8 = sand.u32 1, %s3739_s16   ;;  %s2728_s9 = smul.u32 384, %s3747_s18 }
  0x38   : > { %s3890_s7 = sshll.u32 %s176_s8, 3  ;;  %s3760_s29 = smov [#allocation2]  }
  0x39   : > { %s187_s6 = scalar_lea.hbm %s4373_s0, %s2728_s9  ;;  %s195_s12 = sshll.u32 %s3760_s29, 4  ;;  %s196_s12 = int_to_ptr.vmem [resolvable:$true] %s195_s12 }
  0x3a   : > { %s3647_s13 = scalar_lea.hbm %s187_s6, 384  ;;  %s3649_s21 = scalar_lea.hbm %s4373_s0, 768 }
  0x3b   : > { %p3648_p4 = scmp.ne.s32.totalorder %s187_s6, %s3647_s13  ;;  %p3650_p8 = scmp.lt.u32.totalorder %s187_s6, %s4373_s0 }
  0x3c   : > { %p3651_p10 = scmp.lt.u32.totalorder %s3649_s21, %s3647_s13  ;;  %p3653_p13 = scmp.lt.u32.totalorder %s3647_s13, %s187_s6 }
  0x3e   : > { %p3652_p11 = por %p3651_p10, %p3650_p8 }
  0x40   : > { %p3654_p1 = por %p3653_p13, %p3652_p11 }
  0x42   : > { %p3655_p3 = pnand %p3654_p1, %p3648_p4 }
  0x44   : > { %3658 = shalt.err (!%p3655_p3)  }
  0x45   : > { %s3659_s26 = scalar_lea.vmem %s196_s12, 384  ;;  %p3664_p6 = scmp.lt.s32.totalorder %s196_s12, %s196_s12 }
  0x46   : > { %p3660_p5 = scmp.ne.s32.totalorder %s196_s12, %s3659_s26  ;;  %p3665_p7 = scmp.lt.s32.totalorder %s3659_s26, %s3659_s26 }
  0x48   : > { %p3666_p9 = por %p3665_p7, %p3664_p6 }
  0x4a   : > { %p3667_p12 = pnand %p3666_p9, %p3660_p5 }
  0x4c   : > { %3670 = shalt.err (!%p3667_p12)  }
  0x4d   : > { %198 = dma.hbm_to_vmem [thread:$0]  %s187_s6, 384, %s196_s12, [#allocation3] }
  0x4e   : > { %s178_s5 = scalar_lea.vmem [#allocation7], %s3890_s7 }
  0x4f   : > { %3727 = dma.done.wait [#allocation3], 384 }
  0x50   : > { %3728 = vsyncadd [#allocation3], 4294966912  ;;  %v3761_v0 = vmov 0.0   ;;  %vm3762_vm0 = vmmov 0   ;;  %v3499_v1 = vld [vmem:[#allocation4 + $0x40] sm:$0xff]   ;;  %v3501_v3 = vld [vmem:[#allocation4 + $0x48] sm:$0xff]  }
  0x51   : > { %2901 = vmatprep.subr.bf16.mxu1 %v3761_v0  ;;  %2957 = vmatprep.subr.bf16.mxu0 %v3761_v0  ;;  %v3500_v2 = vld [vmem:[#allocation4 + $0x80] sm:$0xff]   ;;  %v3502_v4 = vld [vmem:[#allocation4 + $0x88] sm:$0xff]   ;;  %v3503_v5 = vld [vmem:[#allocation4 + $0x50] sm:$0xff]   ;;  %vm272_vm1 = vsmask.f32 7424  ;;  %vm809_vm2 = vcmask 1045504  }
  0x52   : > { %2917 = vmatprep.mubr.msk.bf16.mxu1 %vm3762_vm0, %v3761_v0  ;;  %2973 = vmatprep.mubr.msk.bf16.mxu0 %vm3762_vm0, %v3761_v0  ;;  %v3504_v6 = vld [vmem:[#allocation4 + $0x90] sm:$0xff]   ;;  %v3505_v7 = vld [vmem:[#allocation4 + $0x58] sm:$0xff]   ;;  %v3507_v9 = vld [vmem:[#allocation4 + $0x60] sm:$0xff]   ;;  %vm529_vm3 = vcmask 1046528   ;;  %vm666_vm4 = vsmask.f32 6400 }
  0x53   : > { %2902 = vmatpush3.bf16.msra.mxu1 %v3499_v1  ;;  %2958 = vmatpush3.bf16.msra.mxu0 %v3500_v2  ;;  %v3506_v8 = vld [vmem:[#allocation4 + $0x98] sm:$0xff]   ;;  %v3508_v10 = vld [vmem:[#allocation4 + $0xa0] sm:$0xff]   ;;  %v3916_v11 = vld [vmem:[#allocation2] sm:$0xff]  ;;  %vm979_vm5 = vcmask 1041408   ;;  %vm1439_vm7 = vsmask.f32 5376 }
  0x54   : > { %2903 = vmatprep.subr.bf16.mxu1 %v3761_v0  ;;  %2959 = vmatprep.subr.bf16.mxu0 %v3761_v0  ;;  %v3509_v12 = vld [vmem:[#allocation4 + $0x68] sm:$0xff]   ;;  %v276_v13 = vshll.u32 %v3916_v11, 16  ;;  %v3920_v15 = vld [vmem:[#allocation2 + $0x8] sm:$0xff]  ;;  %v274_v17 = vshrl.u32 %v3916_v11, 16  ;;  %v810_v21 = vrot.slane %v3916_v11, 2  ;;  %v3513_v22 = vld [vmem:[#allocation4 + $0x78] sm:$0xff]  }
  0x55   : > { %v3510_v14 = vld [vmem:[#allocation4 + $0xa8] sm:$0xff]   ;;  %v3511_v16 = vld [vmem:[#allocation4 + $0x70] sm:$0xff]   ;;  %v281_v19 = vshll.u32 %v3920_v15, 16  ;;  %v3514_v23 = vld [vmem:[#allocation4 + $0xb8] sm:$0xff]   ;;  %v811_v24 = vrot.slane %v3920_v15, 2  ;;  %v530_v27 = vrot.slane %v3916_v11, 1 }
  0x56   : > { %v278_v18 = vrot.slane %v276_v13, 1  ;;  %v3512_v20 = vld [vmem:[#allocation4 + $0xb0] sm:$0xff]   ;;  %v531_v28 = vrot.slane %v3920_v15, 1  ;;  %v3934_v29 = vld [vmem:[#allocation2 + $0x10] sm:$0xff]  ;;  %v3515_v31 = vld [vmem:[#allocation4] sm:$0xff]   ;;  %v285_v33 = vshrl.u32 %v3920_v15, 16 }
  0x57   : > { %2904 = vmatpush3.bf16.msra.mxu1 %v3501_v3  ;;  %2960 = vmatpush3.bf16.msra.mxu0 %v3502_v4  ;;  %v283_v26 = vrot.slane %v281_v19, 1  ;;  %v3937_v30 = vsel %vm809_vm2, %v810_v21, %v811_v24  ;;  %v289_v34 = vshll.u32 %v3934_v29, 16  ;;  %v3516_v36 = vld [vmem:[#allocation4 + $0xc0] sm:$0xff]   ;;  %v813_v37 = vrot.slane %v3934_v29, 2  ;;  %v3517_v39 = vld [vmem:[#allocation4 + $0x8] sm:$0xff]   ;;  %v3519_v46 = vld [vmem:[#allocation4 + $0x10] sm:$0xff]  }
  0x58   : > { %2905 = vmatprep.subr.bf16.mxu1 %v3761_v0  ;;  %2961 = vmatprep.subr.bf16.mxu0 %v3761_v0  ;;  %v279_v25 = vor.u32 %v278_v18, %v274_v17  ;;  %v532_v35 = vsel %vm529_vm3, %v530_v27, %v531_v28  ;;  %v3518_v42 = vld [vmem:[#allocation4 + $0xc8] sm:$0xff]   ;;  %v533_v43 = vrot.slane %v3934_v29, 1  ;;  %v3957_v44 = vrot.slane %v274_v17, 1  ;;  %v3520_v48 = vld [vmem:[#allocation4 + $0xd0] sm:$0xff]   ;;  %v3521_v51 = vld [vmem:[#allocation4 + $0x18] sm:$0xff]   ;;  %s2731_s26 = sshll.u32 %s3747_s18, 7 }
  0x59   : > { %v3950_v38 = vsel %vm809_vm2, %v811_v24, %v813_v37  ;;  %v287_v40 = vor.u32 %v285_v33, %v283_v26  ;;  %v291_v41 = vrot.slane %v289_v34, 1  ;;  %v671_v45 = vrot.slane %v281_v19, 2  ;;  %v3522_v53 = vld [vmem:[#allocation4 + $0xd8] sm:$0xff]   ;;  %v3523_v57 = vld [vmem:[#allocation4 + $0x20] sm:$0xff]   ;;  %v3525_v60 = vld [vmem:[#allocation4 + $0x28] sm:$0xff]   ;;  %s2499_s9 = sshll.u32 %s178_s5, 4  ;;  %s4318_s6 = scalar_lea.hbm %s4377_s4, %s2731_s26  ;;  %s4320_s9 = int_to_ptr.vmem [resolvable:$true] %s2499_s9 }
  0x5a   : > { %v284_v32 = vsel %vm272_vm1, %v279_v25, %v283_v26  ;;  %v534_v49 = vsel %vm529_vm3, %v531_v28, %v533_v43  ;;  %v668_v50 = vrot.slane %v276_v13, 2  ;;  %v293_v52 = vshrl.u32 %v3934_v29, 16  ;;  %v3524_v58 = vld [vmem:[#allocation4 + $0xe0] sm:$0xff]   ;;  %v3526_v61 = vld [vmem:[#allocation4 + $0xe8] sm:$0xff]   ;;  %v3527_v62 = vld [vmem:[#allocation4 + $0x30] sm:$0xff]   ;;  %s4327_s18 = scalar_lea.sflag [#allocation6], %s176_s8 }
  0x5b   : > { %2906 = vmatpush3.bf16.msra.mxu1 %v3503_v5  ;;  %2962 = vmatpush3.bf16.msra.mxu0 %v3504_v6  ;;  %v292_v47 = vsel %vm272_vm1, %v287_v40, %v291_v41  ;;  %v670_v54 = vrot.slane %v285_v33, 1  ;;  %v675_v56 = vrot.slane %v289_v34, 2  ;;  %v3528_v63 = vld [vmem:[#allocation4 + $0xf0] sm:$0xff]   ;;  %v3529_v1 = vld [vmem:[#allocation4 + $0x38] sm:$0xff]   ;;  %v3531_v5 = vld [vmem:[#allocation4 + $0x100] sm:$0xff]   ;;  %vm1580_vm8 = vcmask 1044480  }
  0x5c   : > { %2907 = vmatprep.subr.bf16.mxu1 %v3761_v0  ;;  %2963 = vmatprep.subr.bf16.mxu0 %v3761_v0  ;;  %v674_v55 = vrot.slane %v293_v52, 1  ;;  %v295_v59 = vor.u32 %v293_v52, %v291_v41  ;;  %v3530_v2 = vld [vmem:[#allocation4 + $0xf8] sm:$0xff]   ;;  %v669_v3 = vor.u32 %v668_v50, %v3957_v44  ;;  %v3536_v13 = vld [vmem:[#allocation4 + $0x128] sm:$0xff]   ;;  %v3541_v18 = vld [vmem:[#allocation4 + $0x190] sm:$0xff]   ;;  %v203_v50 = vlaneseq  ;;  %s3671_s29 = scalar_lea.vmem %s4320_s9, 128  ;;  %p4389_p2 = scmp.ne.s32.totalorder %s4382_s25, 0 }
  0x5d   : > { %v672_v4 = vor.u32 %v671_v45, %v670_v54  ;;  %v3540_v17 = vld [vmem:[#allocation4 + $0x188] sm:$0xff]   ;;  %v3542_v19 = vld [vmem:[#allocation4 + $0x198] sm:$0xff]   ;;  %vm1734_vm9 = vcmask 1043456   ;;  %vm2184_vm10 = vsmask.f32 4352  ;;  %p3672_p0 = scmp.ne.s32.totalorder %s4320_s9, %s3671_s29  ;;  %s3765_s12 = smov [#allocation7]  }
  0x5e   : > { %v3544_v21 = vld [vmem:[#allocation4 + $0x1a8] sm:$0xff]   ;;  %s3675_s13 = sshll.u32 %s3765_s12, 4  ;;  %s3676_s13 = int_to_ptr.vmem [resolvable:$false] %s3675_s13 }
  0x5f   : > { %2908 = vmatpush3.bf16.msra.mxu1 %v3505_v7  ;;  %2964 = vmatpush3.bf16.msra.mxu0 %v3506_v8  ;;  %v673_v6 = vsel %vm666_vm4, %v669_v3, %v672_v4  ;;  %v3532_v7 = vld [vmem:[#allocation4 + $0x108] sm:$0xff]   ;;  %v676_v8 = vor.u32 %v675_v56, %v674_v55  ;;  %v204_v56 = vshrl.u32 %v203_v50, 7  ;;  %v3562_v50 = vld [vmem:[#allocation4 + $0x1f8] sm:$0xff]   ;;  %p3673_p4 = pnand %p3672_p0, %p4389_p2  ;;  %s3677_s14 = scalar_lea.vmem %s3676_s13, 256 }
  0x60   : > { %2909 = vmatprep.subr.bf16.mxu1 %v3761_v0  ;;  %2965 = vmatprep.subr.bf16.mxu0 %v3761_v0  ;;  %v2630_v52 = vld [vmem:[%s4375_s2] ss:$0 sm:$0xff]  ;;  %p3678_p10 = scmp.lt.s32.totalorder %s4320_s9, %s3676_s13  ;;  %p3679_p11 = scmp.lt.s32.totalorder %s3677_s14, %s3671_s29 }
  0x61   : > { %p3674_p8 = pneg %p3673_p4 }
  0x62   : > { %p3680_p13 = por %p3679_p11, %p3678_p10 }
  0x63   : > { %2910 = vmatpush3.bf16.msra.mxu1 %v3507_v9  ;;  %2966 = vmatpush3.bf16.msra.mxu0 %v3508_v10  ;;  %v3533_v9 = vld [vmem:[#allocation4 + $0x110] sm:$0xff]   ;;  %v677_v10 = vsel %vm666_vm4, %v672_v4, %v676_v8 }
  0x64   : > { %2911 = vmatprep.subr.bf16.mxu1 %v3761_v0  ;;  %2967 = vmatprep.subr.bf16.mxu0 %v3761_v0  ;;  %p3681_p1 = pnand %p3680_p13, %p3674_p8 }
  0x67   : > { %2912 = vmatpush3.bf16.msra.mxu1 %v3509_v12  ;;  %2968 = vmatpush3.bf16.msra.mxu0 %v3510_v14  ;;  %v3535_v12 = vld [vmem:[#allocation4 + $0x120] sm:$0xff]   ;;  %v3537_v14 = vld [vmem:[#allocation4 + $0x130] sm:$0xff]  }
  0x68   : > { %2913 = vmatprep.subr.bf16.mxu1 %v3761_v0  ;;  %2969 = vmatprep.subr.bf16.mxu0 %v3761_v0 }
  0x6b   : > { %2914 = vmatpush3.bf16.msra.mxu1 %v3511_v16  ;;  %2970 = vmatpush3.bf16.msra.mxu0 %v3512_v20  ;;  %v3539_v16 = vld [vmem:[#allocation4 + $0x180] sm:$0xff]  }
  0x6c   : > { %2915 = vmatprep.subr.bf16.mxu1 %v3761_v0  ;;  %2971 = vmatprep.subr.bf16.mxu0 %v3761_v0  ;;  %v3543_v20 = vld [vmem:[#allocation4 + $0x1a0] sm:$0xff]  }
  0x6f   : > { %2916 = vmatpush3.bf16.msra.mxu1 %v3513_v22  ;;  %2972 = vmatpush3.bf16.msra.mxu0 %v3514_v23  ;;  %v3545_v22 = vld [vmem:[#allocation4 + $0x1b0] sm:$0xff]   ;;  %v3546_v23 = vld [vmem:[#allocation4 + $0x1b8] sm:$0xff]  }
  0x70   : > { %2929 = vmatprep.subr.bf16.mxu1 %v3761_v0  ;;  %2985 = vmatprep.subr.bf16.mxu0 %v3761_v0 }
  0x72   : > { %2918 = vmatmul.mubr.bf16.vlgmr.msra.gmra.mrb[0].mxu1 %v284_v32  ;;  %2974 = vmatmul.mubr.bf16.vlgmr.msra.gmra.mrb[0].mxu0 %v532_v35 }
  0x73   : > { %2930 = vmatpush3.bf16.msra.mxu1 %v3515_v31  ;;  %2986 = vmatpush3.bf16.msra.mxu0 %v3516_v36 }
  0x74   : > { %2931 = vmatprep.subr.bf16.mxu1 %v3761_v0  ;;  %2987 = vmatprep.subr.bf16.mxu0 %v3761_v0 }
  0x75   : > { %2977 = vmatprep.mubr.msk.bf16.mxu0 %vm3762_vm0, %v3761_v0  ;;  %2921 = vmatprep.mubr.msk.bf16.mxu1 %vm3762_vm0, %v3761_v0 }
  0x77   : > { %2932 = vmatpush3.bf16.msra.mxu1 %v3517_v39  ;;  %2988 = vmatpush3.bf16.msra.mxu0 %v3518_v42 }
  0x78   : > { %2933 = vmatprep.subr.bf16.mxu1 %v3761_v0  ;;  %2989 = vmatprep.subr.bf16.mxu0 %v3761_v0 }
  0x7a   : > { %2922 = vmatmul.mubr.bf16.gmra.mrb[4].mxu1 %v292_v47  ;;  %2978 = vmatmul.mubr.bf16.gmra.mrb[4].mxu0 %v534_v49 }
  0x7b   : > { %2934 = vmatpush3.bf16.msra.mxu1 %v3519_v46  ;;  %2990 = vmatpush3.bf16.msra.mxu0 %v3520_v48 }
  0x7c   : > { %2935 = vmatprep.subr.bf16.mxu1 %v3761_v0  ;;  %2991 = vmatprep.subr.bf16.mxu0 %v3761_v0 }
  0x7d   : > { %2981 = vmatprep.mubr.msk.bf16.mxu0 %vm3762_vm0, %v3761_v0  ;;  %2925 = vmatprep.mubr.msk.bf16.mxu1 %vm3762_vm0, %v3761_v0 }
  0x7f   : > { %2936 = vmatpush3.bf16.msra.mxu1 %v3521_v51  ;;  %2992 = vmatpush3.bf16.msra.mxu0 %v3522_v53 }
  0x80   : > { %2937 = vmatprep.subr.bf16.mxu1 %v3761_v0  ;;  %2993 = vmatprep.subr.bf16.mxu0 %v3761_v0 }
  0x82   : > { %2926 = vmatmul.mubr.bf16.gmra.mrb[8].mxu1 %v295_v59  ;;  %2982 = vmatmul.mubr.bf16.gmra.mrb[8].mxu0 %v533_v43 }
  0x83   : > { %2938 = vmatpush3.bf16.msra.mxu1 %v3523_v57  ;;  %2994 = vmatpush3.bf16.msra.mxu0 %v3524_v58  ;;  %v2631_v57 = vld [vmem:[%s4376_s3] ss:$0 sm:$0xff] }
  0x84   : > { %2939 = vmatprep.subr.bf16.mxu1 %v3761_v0  ;;  %2995 = vmatprep.subr.bf16.mxu0 %v3761_v0 }
  0x85   : > { %2945 = vmatprep.mubr.msk.bf16.mxu1 %vm3762_vm0, %v3761_v0  ;;  %3001 = vmatprep.mubr.msk.bf16.mxu0 %vm3762_vm0, %v3761_v0 }
  0x87   : > { %2940 = vmatpush3.bf16.msra.mxu1 %v3525_v60  ;;  %2996 = vmatpush3.bf16.msra.mxu0 %v3526_v61  ;;  %v206_v60 = vadd.s32 16, %v204_v56  ;;  %v3565_v56 = vld [vmem:[#allocation4 + $0x210] sm:$0xff]  }
  0x88   : > { %2941 = vmatprep.subr.bf16.mxu1 %v3761_v0  ;;  %2997 = vmatprep.subr.bf16.mxu0 %v3761_v0 }
  0x89   : > { %v4038_v4 = vadd.s32 4294967280, %v206_v60  ;;  %v3568_v60 = vld [vmem:[#allocation4 + $0x228] sm:$0xff]  }
  0x8b   : > { %2942 = vmatpush3.bf16.msra.mxu1 %v3527_v62  ;;  %2998 = vmatpush3.bf16.msra.mxu0 %v3528_v63  ;;  %vm226_vm6 = vcmp.lt.s32.totalorder %v4038_v4, 2 }
  0x8c   : > { %2943 = vmatprep.subr.bf16.mxu1 %v3761_v0  ;;  %2999 = vmatprep.subr.bf16.mxu0 %v3761_v0 }
  0x8f   : > { %2944 = vmatpush3.bf16.msra.mxu1 %v3529_v1  ;;  %3000 = vmatpush3.bf16.msra.mxu0 %v3530_v2 }
  0x90   : > { %3041 = vmatprep.subr.bf16.mxu1 %v3761_v0  ;;  %3013 = vmatprep.subr.bf16.mxu0 %v3761_v0 }
  0x92   : > { %2946 = vmatmul.mubr.bf16.vlgmr.msra.gmra.mrb[0].mxu1 %v3916_v11  ;;  %3002 = vmatmul.mubr.bf16.vlgmr.msra.gmra.mrb[0].mxu0 %v673_v6  ;;  %v3534_v11 = vld [vmem:[#allocation4 + $0x118] sm:$0xff]  }
  0x93   : > { %2949 = vmatprep.mubr.msk.bf16.mxu1 %vm3762_vm0, %v3761_v0  ;;  %3014 = vmatpush3.bf16.msra.mxu0 %v3531_v5 }
  0x94   : > { %3005 = vmatprep.mubr.msk.bf16.mxu0 %vm3762_vm0, %v3761_v0  ;;  %3015 = vmatprep.subr.bf16.mxu0 %v3761_v0 }
  0x95   : > { %3042 = vmatpush3.bf16.msra.mxu1 %v3539_v16  ;;  %v3763_v16 = vmov 0  }
  0x96   : > { %3043 = vmatprep.subr.bf16.mxu1 %v3761_v0 }
  0x97   : > { %3016 = vmatpush3.bf16.msra.mxu0 %v3532_v7 }
  0x98   : > { %3017 = vmatprep.subr.bf16.mxu0 %v3761_v0 }
  0x99   : > { %3044 = vmatpush3.bf16.msra.mxu1 %v3540_v17  ;;  %v1043_v17 = vrot.slane %v3763_v16, 1 }
  0x9a   : > { %2950 = vmatmul.mubr.bf16.gmra.mrb[4].mxu1 %v3920_v15  ;;  %3006 = vmatmul.mubr.bf16.gmra.mrb[4].mxu0 %v677_v10  ;;  %v3538_v15 = vld [vmem:[#allocation4 + $0x138] sm:$0xff]  }
  0x9b   : > { %2953 = vmatprep.mubr.msk.bf16.mxu1 %vm3762_vm0, %v3761_v0  ;;  %3018 = vmatpush3.bf16.msra.mxu0 %v3533_v9 }
  0x9c   : > { %3009 = vmatprep.mubr.msk.bf16.mxu0 %vm3762_vm0, %v3761_v0  ;;  %3019 = vmatprep.subr.bf16.mxu0 %v3761_v0 }
  0x9d   : > { %3045 = vmatprep.subr.bf16.mxu1 %v3761_v0 }
  0x9e   : > { %3046 = vmatpush3.bf16.msra.mxu1 %v3541_v18  ;;  %v4048_v18 = vrot.slane %v3763_v16, 2 }
  0x9f   : > { %3020 = vmatpush3.bf16.msra.mxu0 %v3534_v11  ;;  %3047 = vmatprep.subr.bf16.mxu1 %v3761_v0 }
  0xa0   : > { %3021 = vmatprep.subr.bf16.mxu0 %v3761_v0 }
  0xa2   : > { %2954 = vmatmul.mubr.bf16.gmra.mrb[12].mxu1 %v3934_v29  ;;  %3010 = vmatmul.mubr.bf16.gmra.mrb[12].mxu0 %v676_v8 }
  0xa3   : > { %3057 = vmatprep.mubr.msk.bf16.mxu1 %vm3762_vm0, %v3761_v0  ;;  %3022 = vmatpush3.bf16.msra.mxu0 %v3535_v12 }
  0xa4   : > { %3029 = vmatprep.mubr.msk.bf16.mxu0 %vm3762_vm0, %v3761_v0  ;;  %3023 = vmatprep.subr.bf16.mxu0 %v3761_v0 }
  0xa5   : > { %3048 = vmatpush3.bf16.msra.mxu1 %v3542_v19 }
  0xa6   : > { %3049 = vmatprep.subr.bf16.mxu1 %v3761_v0 }
  0xa7   : > { %3024 = vmatpush3.bf16.msra.mxu0 %v3536_v13 }
  0xa8   : > { %3025 = vmatprep.subr.bf16.mxu0 %v3761_v0 }
  0xa9   : > { %3050 = vmatpush3.bf16.msra.mxu1 %v3543_v20 }
  0xaa   : > { %3051 = vmatprep.subr.bf16.mxu1 %v3761_v0 }
  0xab   : > { %3026 = vmatpush3.bf16.msra.mxu0 %v3537_v14 }
  0xac   : > { %3027 = vmatprep.subr.bf16.mxu0 %v3761_v0 }
  0xad   : > { %3052 = vmatpush3.bf16.msra.mxu1 %v3544_v21  ;;  %v1047_v21 = vor.u32 %v4048_v18, %v1043_v17 }
  0xae   : > { %3053 = vmatprep.subr.bf16.mxu1 %v3761_v0 }
  0xaf   : > { %3028 = vmatpush3.bf16.msra.mxu0 %v3538_v15 }
  0xb0   : > { %3181 = vmatprep.subr.bf16.mxu0 %v3761_v0 }
  0xb1   : > { %3054 = vmatpush3.bf16.msra.mxu1 %v3545_v22 }
  0xb2   : > { %3030 = vmatmul.mubr.bf16.vlgmr.msra.gmra.mrb[0].mxu0 %v3937_v30  ;;  %3055 = vmatprep.subr.bf16.mxu1 %v3761_v0 }
  0xb3   : > { %3033 = vmatprep.mubr.msk.bf16.mxu0 %vm3762_vm0, %v3761_v0 }
  0xb5   : > { %3056 = vmatpush3.bf16.msra.mxu1 %v3546_v23 }
  0xb6   : > { %3069 = vmatprep.subr.bf16.mxu1 %v3761_v0 }
  0xba   : > { %3034 = vmatmul.mubr.bf16.gmra.mrb[4].mxu0 %v3950_v38 }
  0xbb   : > { %3037 = vmatprep.mubr.msk.bf16.mxu0 %vm3762_vm0, %v3761_v0 }
  0xc2   : > { %3038 = vmatmul.mubr.bf16.gmra.mrb[16].mxu0 %v813_v37 }
  0xc3   : > { %3197 = vmatprep.mubr.msk.bf16.mxu0 %vm3762_vm0, %v3761_v0 }
 0x155   : > { %v397_v24 = vpop.f32.mrb[8].mxu1  ;;  %v636_v25 = vpop.f32.mrb[8].mxu0 }
 0x156   : > { %v2927_v26 = vpop.f32.mrb[9].mxu1  ;;  %v2983_v27 = vpop.f32.mrb[9].mxu0 }
 0x157   : > { %v400_v28 = vpop.f32.mrb[10].mxu1  ;;  %v639_v29 = vpop.f32.mrb[10].mxu0  ;;  %v3547_v27 = vld [vmem:[#allocation4 + $0x140] sm:$0xff]  }
 0x158   : > { %v2928_v30 = vpop.f32.mrb[11].mxu1  ;;  %v2984_v31 = vpop.f32.mrb[11].mxu0 }
 0x159   : > { %v3548_v30 = vld [vmem:[#allocation4 + $0x148] sm:$0xff]   ;;  %v3549_v31 = vld [vmem:[#allocation4 + $0x150] sm:$0xff]  }
 0x165   : > { %v486_v32 = vpop.f32.mrb[0].mxu1 }
 0x166   : > { %v2947_v33 = vpop.f32.mrb[1].mxu1 }
 0x167   : > { %v489_v34 = vpop.f32.mrb[2].mxu1  ;;  %v3550_v33 = vld [vmem:[#allocation4 + $0x158] sm:$0xff]  }
 0x168   : > { %v2948_v35 = vpop.f32.mrb[3].mxu1 }
 0x169   : > { %v3552_v35 = vld [vmem:[#allocation4 + $0x168] sm:$0xff]  }
 0x16d   : > { %v494_v36 = vpop.f32.mrb[4].mxu1 }
 0x16e   : > { %v2951_v37 = vpop.f32.mrb[5].mxu1 }
 0x16f   : > { %v497_v38 = vpop.f32.mrb[6].mxu1  ;;  %v3554_v37 = vld [vmem:[#allocation4 + $0x178] sm:$0xff]  }
 0x170   : > { %v2952_v39 = vpop.f32.mrb[7].mxu1  ;;  %v3764_v38 = vmov 0.0|0.0  }
 0x171   : > { %v1176_v39 = vrot.slane %v3764_v38, 1 }
 0x175   : > { %v502_v40 = vpop.f32.mrb[12].mxu1  ;;  %v779_v41 = vpop.f32.mrb[12].mxu0 }
 0x176   : > { %v2955_v42 = vpop.f32.mrb[13].mxu1  ;;  %v3011_v43 = vpop.f32.mrb[13].mxu0  ;;  %v3555_v41 = vld [vmem:[#allocation4 + $0x1c0] sm:$0xff]  }
 0x177   : > { %v505_v44 = vpop.f32.mrb[14].mxu1  ;;  %v782_v45 = vpop.f32.mrb[14].mxu0  ;;  %v3556_v43 = vld [vmem:[#allocation4 + $0x1c8] sm:$0xff]  }
 0x178   : > { %v2956_v46 = vpop.f32.mrb[15].mxu1  ;;  %v3012_v47 = vpop.f32.mrb[15].mxu0  ;;  %v3557_v44 = vld [vmem:[#allocation4 + $0x1d0] sm:$0xff]  }
 0x179   : > { %v3558_v46 = vld [vmem:[#allocation4 + $0x1d8] sm:$0xff]   ;;  %v3559_v47 = vld [vmem:[#allocation4 + $0x1e0] sm:$0xff]  }
 0x185   : > { %v900_v48 = vpop.f32.mrb[0].mxu0 }
 0x186   : > { %v3031_v49 = vpop.f32.mrb[1].mxu0  ;;  %v3560_v48 = vld [vmem:[#allocation4 + $0x1e8] sm:$0xff]  }
 0x187   : > { %v903_v51 = vpop.f32.mrb[2].mxu0  ;;  %v3561_v49 = vld [vmem:[#allocation4 + $0x1f0] sm:$0xff]  }
 0x188   : > { %v3337_v53 = vadd.f32 %v903_v51, %v489_v34  ;;  %v3032_v54 = vpop.f32.mrb[3].mxu0  ;;  %v3551_v34 = vld [vmem:[#allocation4 + $0x160] sm:$0xff]   ;;  %v4089_v51 = vrot.slane %v3764_v38, 2 }
 0x18a   : > { %v937_v55 = vmul.f32 %v3337_v53, %v2630_v52  ;;  %v3563_v53 = vld [vmem:[#allocation4 + $0x200] sm:$0xff]  }
 0x18c   : > { %v950_v59 = vadd.f32 %v2631_v57, %v937_v55  ;;  %v3564_v55 = vld [vmem:[#allocation4 + $0x208] sm:$0xff]  }
 0x18d   : > { %v908_v58 = vpop.f32.mrb[4].mxu0 }
 0x18e   : > { %v3338_v61 = vadd.f32 %v908_v58, %v494_v36  ;;  %v3035_v62 = vpop.f32.mrb[5].mxu0  ;;  %v956_v3 = vmax.f32 %v950_v59, 0.0  ;;  %v3553_v36 = vld [vmem:[#allocation4 + $0x170] sm:$0xff]   ;;  %v3566_v58 = vld [vmem:[#allocation4 + $0x218] sm:$0xff]   ;;  %v3567_v59 = vld [vmem:[#allocation4 + $0x220] sm:$0xff]  }
 0x18f   : > { %v911_v63 = vpop.f32.mrb[6].mxu0  ;;  %v4111_v62 = vrot.slane %v3763_v16, 3 }
 0x190   : > { %v938_v1 = vmul.f32 %v3338_v61, %v2630_v52  ;;  %v3036_v2 = vpop.f32.mrb[7].mxu0  ;;  %v981_v8 = vrot.slane %v956_v3, 6  ;;  %v3569_v61 = vld [vmem:[#allocation4 + $0x230] sm:$0xff]   ;;  %v3570_v63 = vld [vmem:[#allocation4 + $0x238] sm:$0xff]  }
 0x191   : > { %v3571_v2 = vld [vmem:[#allocation4 + $0x240] sm:$0xff]  }
 0x192   : > { %v951_v5 = vadd.f32 %v2631_v57, %v938_v1  ;;  %v4116_v1 = vor.u32 %v4111_v62, %v4048_v18 }
 0x194   : > { %v957_v6 = vmax.f32 %v951_v5, 0.0  ;;  %v3572_v5 = vld [vmem:[#allocation4 + $0x248] sm:$0xff]  }
 0x195   : > { %v916_v7 = vpop.f32.mrb[16].mxu0 }
 0x196   : > { %v983_v9 = vrot.slane %v957_v6, 6  ;;  %v3039_v10 = vpop.f32.mrb[17].mxu0  ;;  %v3573_v6 = vld [vmem:[#allocation4 + $0x250] sm:$0xff]  }
 0x197   : > { %v919_v11 = vpop.f32.mrb[18].mxu0  ;;  %v3576_v10 = vld [vmem:[#allocation4 + $0x268] sm:$0xff]  }
 0x198   : > { %v984_v12 = vsel %vm979_vm5, %v981_v8, %v983_v9  ;;  %v3040_v13 = vpop.f32.mrb[19].mxu0  ;;  %v3574_v8 = vld [vmem:[#allocation4 + $0x258] sm:$0xff]   ;;  %v3575_v9 = vld [vmem:[#allocation4 + $0x260] sm:$0xff]   ;;  %v3577_v11 = vld [vmem:[#allocation4 + $0x270] sm:$0xff]  }
 0x199   : > { %v999_v14 = vsel %vm226_vm6, %v984_v12, 0.0  ;;  %v3578_v12 = vld [vmem:[#allocation4 + $0x278] sm:$0xff]   ;;  %v4140_v13 = vrot.slane %v3764_v38, 3 }
 0x19a   : > { %v4044_v15 = vpack.c.bf16 %v3761_v0, %v999_v14 }
 0x19c   : > { %v1049_v19 = vshrl.u32 %v4044_v15, 16  ;;  %v1052_v20 = vshll.u32 %v4044_v15, 16  ;;  %v1177_v40 = vrot.slane %v4044_v15, 1  ;;  %v1306_v52 = vrot.slane %v4044_v15, 2 }
 0x19d   : > { %v1582_v14 = vrot.slane %v4044_v15, 3  ;;  %v4155_v15 = vld [vmem:[#allocation4 + $0x380] sm:$0xff]  }
 0x19e   : > { %v1051_v22 = vrot.slane %v1049_v19, 1  ;;  %v1054_v23 = vrot.slane %v1052_v20, 2  ;;  %v1443_v24 = vrot.slane %v1049_v19, 2  ;;  %v1444_v25 = vrot.slane %v1052_v20, 3  ;;  %v3580_v19 = vld [vmem:[#allocation4 + $0x2c0] sm:$0xff]   ;;  %v4158_v20 = vld [vmem:[#allocation4 + $0x388] sm:$0xff]  }
 0x19f   : > { %v1178_v42 = vsel %vm529_vm3, %v1176_v39, %v1177_v40  ;;  %v1180_v45 = vsel %vm529_vm3, %v1177_v40, %v1176_v39  ;;  %v1307_v54 = vsel %vm809_vm2, %v4089_v51, %v1306_v52  ;;  %v1309_v57 = vsel %vm809_vm2, %v1306_v52, %v4089_v51  ;;  %3182 = vmatpush3.bf16.msra.mxu0 %v3580_v19 }
 0x1a0   : > { %v1055_v26 = vor.u32 %v1054_v23, %v1051_v22  ;;  %v4053_v28 = vor.u32 %v1444_v25, %v1443_v24  ;;  %v1583_v17 = vsel %vm1580_vm8, %v4140_v13, %v1582_v14  ;;  %v1585_v18 = vsel %vm1580_vm8, %v1582_v14, %v4140_v13  ;;  %3183 = vmatprep.subr.bf16.mxu0 %v3761_v0  ;;  %v4164_v22 = vld [vmem:[#allocation4 + $0x390] sm:$0xff]   ;;  %v4169_v24 = vld [vmem:[#allocation4 + $0x398] sm:$0xff]  }
 0x1a1   : > { %v3584_v23 = vld [vmem:[#allocation4 + $0x2d0] sm:$0xff]   ;;  %v3586_v25 = vld [vmem:[#allocation4 + $0x2d8] sm:$0xff]   ;;  %v2322_v19 = vrot.slane %v3764_v38, 4 }
 0x1a2   : > { %v1056_v29 = vsel %vm666_vm4, %v1047_v21, %v1055_v26  ;;  %v1065_v32 = vsel %vm666_vm4, %v1055_v26, %v1047_v21  ;;  %v1446_v3 = vsel %vm1439_vm7, %v4116_v1, %v4053_v28  ;;  %v1450_v7 = vsel %vm1439_vm7, %v4053_v28, %v4116_v1  ;;  %v4174_v26 = vld [vmem:[#allocation4 + $0x3a0] sm:$0xff]   ;;  %v4179_v28 = vld [vmem:[#allocation4 + $0x3a8] sm:$0xff]  }
 0x1a3   : > { %3058 = vmatmul.mubr.bf16.vlgmr.msra.gmra.mrb[16].mxu1 %v1056_v29  ;;  %v3590_v29 = vld [vmem:[#allocation4 + $0x2e8] sm:$0xff]  }
 0x1a4   : > { %3070 = vmatpush3.bf16.msra.mxu1 %v3547_v27  ;;  %3061 = vmatprep.mubr.msk.bf16.mxu1 %vm3762_vm0, %v3761_v0  ;;  %v3588_v27 = vld [vmem:[#allocation4 + $0x2e0] sm:$0xff]  }
 0x1a5   : > { %3071 = vmatprep.subr.bf16.mxu1 %v3761_v0 }
 0x1a8   : > { %3072 = vmatpush3.bf16.msra.mxu1 %v3548_v30 }
 0x1a9   : > { %3073 = vmatprep.subr.bf16.mxu1 %v3761_v0 }
 0x1ab   : > { %3062 = vmatmul.mubr.bf16.gmra.mrb[20].mxu1 %v1065_v32 }
 0x1ac   : > { %3074 = vmatpush3.bf16.msra.mxu1 %v3549_v31  ;;  %3065 = vmatprep.mubr.msk.bf16.mxu1 %vm3762_vm0, %v3761_v0  ;;  %v4184_v31 = vld [vmem:[#allocation4 + $0x3b0] sm:$0xff]  }
 0x1ad   : > { %3075 = vmatprep.subr.bf16.mxu1 %v3761_v0 }
 0x1b0   : > { %3076 = vmatpush3.bf16.msra.mxu1 %v3550_v33 }
 0x1b1   : > { %3077 = vmatprep.subr.bf16.mxu1 %v3761_v0 }
 0x1b3   : > { %3066 = vmatmul.mubr.bf16.gmra.mrb[24].mxu1 %v1047_v21  ;;  %v3582_v21 = vld [vmem:[#allocation4 + $0x2c8] sm:$0xff]  }
 0x1b4   : > { %3078 = vmatpush3.bf16.msra.mxu1 %v3551_v34  ;;  %3085 = vmatprep.mubr.msk.bf16.mxu1 %vm3762_vm0, %v3761_v0 }
 0x1b5   : > { %3079 = vmatprep.subr.bf16.mxu1 %v3761_v0  ;;  %3184 = vmatpush3.bf16.msra.mxu0 %v3582_v21 }
 0x1b6   : > { %3185 = vmatprep.subr.bf16.mxu0 %v3761_v0 }
 0x1b8   : > { %3080 = vmatpush3.bf16.msra.mxu1 %v3552_v35  ;;  %v3592_v35 = vld [vmem:[#allocation4 + $0x2f0] sm:$0xff]  }
 0x1b9   : > { %3081 = vmatprep.subr.bf16.mxu1 %v3761_v0  ;;  %3186 = vmatpush3.bf16.msra.mxu0 %v3584_v23 }
 0x1ba   : > { %3187 = vmatprep.subr.bf16.mxu0 %v3761_v0 }
 0x1bc   : > { %3082 = vmatpush3.bf16.msra.mxu1 %v3553_v36  ;;  %v4189_v36 = vld [vmem:[#allocation4 + $0x3b8] sm:$0xff]  }
 0x1bd   : > { %3083 = vmatprep.subr.bf16.mxu1 %v3761_v0  ;;  %3188 = vmatpush3.bf16.msra.mxu0 %v3586_v25 }
 0x1be   : > { %3189 = vmatprep.subr.bf16.mxu0 %v3761_v0 }
 0x1c0   : > { %3084 = vmatpush3.bf16.msra.mxu1 %v3554_v37  ;;  %v3594_v37 = vld [vmem:[#allocation4 + $0x2f8] sm:$0xff]  }
 0x1c1   : > { %3097 = vmatprep.subr.bf16.mxu1 %v3761_v0  ;;  %3190 = vmatpush3.bf16.msra.mxu0 %v3588_v27 }
 0x1c2   : > { %3191 = vmatprep.subr.bf16.mxu0 %v3761_v0 }
 0x1c3   : > { %3086 = vmatmul.mubr.bf16.vlgmr.msra.gmra.mrb[16].mxu1 %v1178_v42 }
 0x1c4   : > { %3098 = vmatpush3.bf16.msra.mxu1 %v3555_v41  ;;  %3089 = vmatprep.mubr.msk.bf16.mxu1 %vm3762_vm0, %v3761_v0 }
 0x1c5   : > { %3099 = vmatprep.subr.bf16.mxu1 %v3761_v0  ;;  %3192 = vmatpush3.bf16.msra.mxu0 %v3590_v29 }
 0x1c6   : > { %3193 = vmatprep.subr.bf16.mxu0 %v3761_v0 }
 0x1c8   : > { %3100 = vmatpush3.bf16.msra.mxu1 %v3556_v43 }
 0x1c9   : > { %3101 = vmatprep.subr.bf16.mxu1 %v3761_v0  ;;  %3194 = vmatpush3.bf16.msra.mxu0 %v3592_v35  ;;  %v3595_v35 = vld [vmem:[#allocation4 + $0x280] sm:$0xff]  }
 0x1ca   : > { %3195 = vmatprep.subr.bf16.mxu0 %v3761_v0 }
 0x1cb   : > { %3090 = vmatmul.mubr.bf16.gmra.mrb[20].mxu1 %v1180_v45 }
 0x1cc   : > { %3102 = vmatpush3.bf16.msra.mxu1 %v3557_v44  ;;  %3093 = vmatprep.mubr.msk.bf16.mxu1 %vm3762_vm0, %v3761_v0 }
 0x1cd   : > { %3103 = vmatprep.subr.bf16.mxu1 %v3761_v0  ;;  %3196 = vmatpush3.bf16.msra.mxu0 %v3594_v37 }
 0x1ce   : > { %3209 = vmatprep.subr.bf16.mxu0 %v3761_v0 }
 0x1d0   : > { %3104 = vmatpush3.bf16.msra.mxu1 %v3558_v46 }
 0x1d1   : > { %3105 = vmatprep.subr.bf16.mxu1 %v3761_v0 }
 0x1d3   : > { %3094 = vmatmul.mubr.bf16.gmra.mrb[28].mxu1 %v1176_v39 }
 0x1d4   : > { %3106 = vmatpush3.bf16.msra.mxu1 %v3559_v47  ;;  %3113 = vmatprep.mubr.msk.bf16.mxu1 %vm3762_vm0, %v3761_v0 }
 0x1d5   : > { %3107 = vmatprep.subr.bf16.mxu1 %v3761_v0 }
 0x1d8   : > { %3108 = vmatpush3.bf16.msra.mxu1 %v3560_v48 }
 0x1d9   : > { %3109 = vmatprep.subr.bf16.mxu1 %v3761_v0 }
 0x1dc   : > { %3110 = vmatpush3.bf16.msra.mxu1 %v3561_v49 }
 0x1dd   : > { %3111 = vmatprep.subr.bf16.mxu1 %v3761_v0 }
 0x1e0   : > { %3112 = vmatpush3.bf16.msra.mxu1 %v3562_v50 }
 0x1e1   : > { %3125 = vmatprep.subr.bf16.mxu1 %v3761_v0 }
 0x1e3   : > { %3114 = vmatmul.mubr.bf16.vlgmr.msra.gmra.mrb[16].mxu1 %v1307_v54 }
 0x1e4   : > { %3126 = vmatpush3.bf16.msra.mxu1 %v3563_v53  ;;  %3117 = vmatprep.mubr.msk.bf16.mxu1 %vm3762_vm0, %v3761_v0  ;;  %v2673_v53 = vld [vmem:[%s4375_s2 + $0x1] ss:$0 sm:$0xff] }
 0x1e5   : > { %3127 = vmatprep.subr.bf16.mxu1 %v3761_v0 }
 0x1e8   : > { %3128 = vmatpush3.bf16.msra.mxu1 %v3564_v55 }
 0x1e9   : > { %3129 = vmatprep.subr.bf16.mxu1 %v3761_v0 }
 0x1eb   : > { %3118 = vmatmul.mubr.bf16.gmra.mrb[20].mxu1 %v1309_v57 }
 0x1ec   : > { %3130 = vmatpush3.bf16.msra.mxu1 %v3565_v56  ;;  %3121 = vmatprep.mubr.msk.bf16.mxu1 %vm3762_vm0, %v3761_v0 }
 0x1ed   : > { %3131 = vmatprep.subr.bf16.mxu1 %v3761_v0 }
 0x1f0   : > { %3132 = vmatpush3.bf16.msra.mxu1 %v3566_v58  ;;  %v2675_v58 = vld [vmem:[%s4376_s3 + $0x1] ss:$0 sm:$0xff] }
 0x1f1   : > { %3133 = vmatprep.subr.bf16.mxu1 %v3761_v0 }
 0x1f3   : > { %3122 = vmatmul.mubr.bf16.gmra.mrb[32].mxu1 %v4089_v51 }
 0x1f4   : > { %3134 = vmatpush3.bf16.msra.mxu1 %v3567_v59  ;;  %3141 = vmatprep.mubr.msk.bf16.mxu1 %vm3762_vm0, %v3761_v0 }
 0x1f5   : > { %3135 = vmatprep.subr.bf16.mxu1 %v3761_v0 }
 0x1f8   : > { %3136 = vmatpush3.bf16.msra.mxu1 %v3568_v60 }
 0x1f9   : > { %3137 = vmatprep.subr.bf16.mxu1 %v3761_v0 }
 0x1fc   : > { %3138 = vmatpush3.bf16.msra.mxu1 %v3569_v61 }
 0x1fd   : > { %3139 = vmatprep.subr.bf16.mxu1 %v3761_v0 }
 0x200   : > { %3140 = vmatpush3.bf16.msra.mxu1 %v3570_v63 }
 0x201   : > { %3153 = vmatprep.subr.bf16.mxu1 %v3761_v0 }
 0x203   : > { %3142 = vmatmul.mubr.bf16.vlgmr.msra.gmra.mrb[16].mxu1 %v1446_v3 }
 0x204   : > { %3154 = vmatpush3.bf16.msra.mxu1 %v3571_v2  ;;  %3145 = vmatprep.mubr.msk.bf16.mxu1 %vm3762_vm0, %v3761_v0 }
 0x205   : > { %3155 = vmatprep.subr.bf16.mxu1 %v3761_v0 }
 0x208   : > { %3156 = vmatpush3.bf16.msra.mxu1 %v3572_v5 }
 0x209   : > { %3157 = vmatprep.subr.bf16.mxu1 %v3761_v0 }
 0x20b   : > { %3146 = vmatmul.mubr.bf16.gmra.mrb[20].mxu1 %v1450_v7 }
 0x20c   : > { %3158 = vmatpush3.bf16.msra.mxu1 %v3573_v6  ;;  %3149 = vmatprep.mubr.msk.bf16.mxu1 %vm3762_vm0, %v3761_v0 }
 0x20d   : > { %3159 = vmatprep.subr.bf16.mxu1 %v3761_v0 }
 0x210   : > { %3160 = vmatpush3.bf16.msra.mxu1 %v3574_v8 }
 0x211   : > { %3161 = vmatprep.subr.bf16.mxu1 %v3761_v0 }
 0x213   : > { %3150 = vmatmul.mubr.bf16.gmra.mrb[36].mxu1 %v4116_v1 }
 0x214   : > { %3162 = vmatpush3.bf16.msra.mxu1 %v3575_v9  ;;  %3169 = vmatprep.mubr.msk.bf16.mxu1 %vm3762_vm0, %v3761_v0 }
 0x215   : > { %3163 = vmatprep.subr.bf16.mxu1 %v3761_v0 }
 0x218   : > { %3164 = vmatpush3.bf16.msra.mxu1 %v3576_v10 }
 0x219   : > { %3165 = vmatprep.subr.bf16.mxu1 %v3761_v0 }
 0x21c   : > { %3166 = vmatpush3.bf16.msra.mxu1 %v3577_v11 }
 0x21d   : > { %3167 = vmatprep.subr.bf16.mxu1 %v3761_v0 }
 0x220   : > { %3168 = vmatpush3.bf16.msra.mxu1 %v3578_v12 }
 0x221   : > { %3321 = vmatprep.subr.bf16.mxu1 %v3761_v0 }
 0x223   : > { %3170 = vmatmul.mubr.bf16.vlgmr.msra.gmra.mrb[16].mxu1 %v1583_v17 }
 0x224   : > { %3173 = vmatprep.mubr.msk.bf16.mxu1 %vm3762_vm0, %v3761_v0  ;;  %3329 = vmatpush3.bf16.msra.mxu1 %v4155_v15 }
 0x225   : > { %3322 = vmatprep.subr.bf16.mxu1 %v3761_v0 }
 0x228   : > { %3330 = vmatpush3.bf16.msra.mxu1 %v4158_v20 }
 0x229   : > { %3323 = vmatprep.subr.bf16.mxu1 %v3761_v0 }
 0x22b   : > { %3174 = vmatmul.mubr.bf16.gmra.mrb[20].mxu1 %v1585_v18 }
 0x22c   : > { %3177 = vmatprep.mubr.msk.bf16.mxu1 %vm3762_vm0, %v3761_v0  ;;  %3331 = vmatpush3.bf16.msra.mxu1 %v4164_v22 }
 0x22d   : > { %3324 = vmatprep.subr.bf16.mxu1 %v3761_v0 }
 0x230   : > { %3332 = vmatpush3.bf16.msra.mxu1 %v4169_v24 }
 0x231   : > { %3325 = vmatprep.subr.bf16.mxu1 %v3761_v0 }
 0x233   : > { %3178 = vmatmul.mubr.bf16.gmra.mrb[40].mxu1 %v4140_v13 }
 0x234   : > { %3313 = vmatprep.mubr.msk.bf16.mxu1 %vm3762_vm0, %v3761_v0  ;;  %3333 = vmatpush3.bf16.msra.mxu1 %v4174_v26 }
 0x235   : > { %3326 = vmatprep.subr.bf16.mxu1 %v3761_v0 }
 0x238   : > { %3334 = vmatpush3.bf16.msra.mxu1 %v4179_v28 }
 0x239   : > { %3327 = vmatprep.subr.bf16.mxu1 %v3761_v0 }
 0x23c   : > { %3335 = vmatpush3.bf16.msra.mxu1 %v4184_v31 }
 0x23d   : > { %3328 = vmatprep.subr.bf16.mxu1 %v3761_v0 }
 0x240   : > { %3336 = vmatpush3.bf16.msra.mxu1 %v4189_v36 }
 0x286   : > { %v1167_v30 = vpop.f32.mrb[24].mxu1 }
 0x287   : > { %v3067_v32 = vpop.f32.mrb[25].mxu1 }
 0x288   : > { %v1170_v33 = vpop.f32.mrb[26].mxu1 }
 0x289   : > { %v3068_v34 = vpop.f32.mrb[27].mxu1 }
 0x2a6   : > { %v1282_v39 = vpop.f32.mrb[28].mxu1 }
 0x2a7   : > { %v3095_v40 = vpop.f32.mrb[29].mxu1 }
 0x2a8   : > { %v1285_v41 = vpop.f32.mrb[30].mxu1 }
 0x2a9   : > { %v3096_v42 = vpop.f32.mrb[31].mxu1  ;;  %v3596_v41 = vld [vmem:[#allocation4 + $0x288] sm:$0xff]  }
 0x2aa   : > { %v3597_v42 = vld [vmem:[#allocation4 + $0x290] sm:$0xff]  }
 0x2c6   : > { %v1411_v43 = vpop.f32.mrb[32].mxu1 }
 0x2c7   : > { %v3123_v44 = vpop.f32.mrb[33].mxu1 }
 0x2c8   : > { %v1414_v45 = vpop.f32.mrb[34].mxu1  ;;  %v3598_v44 = vld [vmem:[#allocation4 + $0x298] sm:$0xff]  }
 0x2c9   : > { %v3124_v46 = vpop.f32.mrb[35].mxu1  ;;  %v3599_v45 = vld [vmem:[#allocation4 + $0x2a0] sm:$0xff]  }
 0x2ca   : > { %v3600_v46 = vld [vmem:[#allocation4 + $0x2a8] sm:$0xff]  }
 0x2e6   : > { %v1552_v47 = vpop.f32.mrb[36].mxu1 }
 0x2e7   : > { %v3151_v48 = vpop.f32.mrb[37].mxu1  ;;  %v3601_v47 = vld [vmem:[#allocation4 + $0x2b0] sm:$0xff]  }
 0x2e8   : > { %v1555_v49 = vpop.f32.mrb[38].mxu1  ;;  %v3602_v48 = vld [vmem:[#allocation4 + $0x2b8] sm:$0xff]  }
 0x2e9   : > { %v3152_v50 = vpop.f32.mrb[39].mxu1 }
 0x2ea   : > { %v3603_v50 = vld [vmem:[#allocation4 + $0x300] sm:$0xff]  }
 0x2f6   : > { %v1671_v52 = vpop.f32.mrb[16].mxu1 }
 0x2f7   : > { %v3171_v54 = vpop.f32.mrb[17].mxu1  ;;  %v3604_v52 = vld [vmem:[#allocation4 + $0x308] sm:$0xff]  }
 0x2f8   : > { %v1674_v55 = vpop.f32.mrb[18].mxu1 }
 0x2f9   : > { %v1707_v56 = vmul.f32 %v2673_v53, %v1674_v55  ;;  %v3172_v57 = vpop.f32.mrb[19].mxu1  ;;  %v3606_v55 = vld [vmem:[#allocation4 + $0x318] sm:$0xff]  }
 0x2fa   : > { %v3608_v57 = vld [vmem:[#allocation4 + $0x328] sm:$0xff]  }
 0x2fb   : > { %v1720_v59 = vadd.f32 %v2675_v58, %v1707_v56  ;;  %v3607_v56 = vld [vmem:[#allocation4 + $0x320] sm:$0xff]  }
 0x2fd   : > { %v1725_v3 = vmax.f32 %v1720_v59, 0.0  ;;  %v3610_v59 = vld [vmem:[#allocation4 + $0x338] sm:$0xff]  }
 0x2fe   : > { %v1679_v60 = vpop.f32.mrb[20].mxu1 }
 0x2ff   : > { %v1708_v61 = vmul.f32 %v2673_v53, %v1679_v60  ;;  %v3175_v63 = vpop.f32.mrb[21].mxu1  ;;  %v1736_v8 = vrot.slane %v1725_v3, 4  ;;  %v3605_v53 = vld [vmem:[#allocation4 + $0x310] sm:$0xff]  }
 0x300   : > { %v1682_v2 = vpop.f32.mrb[22].mxu1  ;;  %v3612_v63 = vld [vmem:[#allocation4 + $0x348] sm:$0xff]  }
 0x301   : > { %v1721_v5 = vadd.f32 %v2675_v58, %v1708_v61  ;;  %v3176_v6 = vpop.f32.mrb[23].mxu1  ;;  %v3609_v58 = vld [vmem:[#allocation4 + $0x330] sm:$0xff]   ;;  %v3611_v61 = vld [vmem:[#allocation4 + $0x340] sm:$0xff]  }
 0x302   : > { %v3613_v2 = vld [vmem:[#allocation4 + $0x350] sm:$0xff]   ;;  %v3615_v6 = vld [vmem:[#allocation4 + $0x360] sm:$0xff]  }
 0x303   : > { %v1726_v7 = vmax.f32 %v1721_v5, 0.0  ;;  %v3614_v5 = vld [vmem:[#allocation4 + $0x358] sm:$0xff]  }
 0x305   : > { %v1738_v9 = vrot.slane %v1726_v7, 4  ;;  %v3616_v7 = vld [vmem:[#allocation4 + $0x368] sm:$0xff]  }
 0x306   : > { %v1687_v10 = vpop.f32.mrb[40].mxu1 }
 0x307   : > { %v1739_v11 = vsel %vm1734_vm9, %v1736_v8, %v1738_v9  ;;  %v3179_v12 = vpop.f32.mrb[41].mxu1  ;;  %v3617_v8 = vld [vmem:[#allocation4 + $0x370] sm:$0xff]   ;;  %v2186_v9 = vrot.slane %v3763_v16, 4  ;;  %v3618_v10 = vld [vmem:[#allocation4 + $0x378] sm:$0xff]  }
 0x308   : > { %v1752_v14 = vsel %vm226_vm6, %v1739_v11, 0.0  ;;  %v1690_v17 = vpop.f32.mrb[42].mxu1 }
 0x309   : > { %v4204_v18 = vpack.c.bf16 %v3761_v0, %v1752_v14  ;;  %v3180_v21 = vpop.f32.mrb[43].mxu1  ;;  %v2187_v11 = vor.u32 %v2186_v9, %v4111_v62 }
 0x30b   : > { %v2323_v23 = vrot.slane %v4204_v18, 4  ;;  %v1802_v25 = vshrl.u32 %v4204_v18, 16  ;;  %v1805_v27 = vshll.u32 %v4204_v18, 16  ;;  %v1928_v49 = vrot.slane %v4204_v18, 2 }
 0x30c   : > { %v2055_v60 = vrot.slane %v4204_v18, 3 }
 0x30d   : > { %v2326_v29 = vsel %vm1734_vm9, %v2323_v23, %v2322_v19  ;;  %v1804_v30 = vrot.slane %v1802_v25, 2  ;;  %v1807_v32 = vrot.slane %v1805_v27, 3  ;;  %v2188_v33 = vrot.slane %v1802_v25, 3 }
 0x30e   : > { %3314 = vmatmul.mubr.bf16.vlgmr.msra.gmra.mrb[44].mxu1 %v2326_v29  ;;  %v2189_v37 = vrot.slane %v1805_v27, 4  ;;  %v4212_v39 = vsel %vm1734_vm9, %v2322_v19, %v2323_v23  ;;  %v1931_v54 = vsel %vm809_vm2, %v1928_v49, %v4089_v51  ;;  %v2058_v3 = vsel %vm1580_vm8, %v2055_v60, %v4140_v13 }
 0x30f   : > { %v1808_v34 = vor.u32 %v1807_v32, %v1804_v30  ;;  %3317 = vmatprep.mubr.msk.bf16.mxu1 %vm3762_vm0, %v3761_v0 }
 0x310   : > { %v4218_v40 = vor.u32 %v2189_v37, %v2188_v33 }
 0x311   : > { %v1809_v38 = vsel %vm1439_vm7, %v4116_v1, %v1808_v34  ;;  %v1818_v43 = vsel %vm1439_vm7, %v1808_v34, %v4116_v1 }
 0x312   : > { %3198 = vmatmul.mubr.bf16.vlgmr.msra.gmra.mrb[20].mxu0 %v1809_v38  ;;  %v2195_v16 = vsel %vm2184_vm10, %v4218_v40, %v2187_v11 }
 0x313   : > { %3210 = vmatpush3.bf16.msra.mxu0 %v3595_v35  ;;  %3201 = vmatprep.mubr.msk.bf16.mxu0 %vm3762_vm0, %v3761_v0 }
 0x314   : > { %3211 = vmatprep.subr.bf16.mxu0 %v3761_v0 }
 0x316   : > { %3318 = vmatmul.mubr.bf16.gmra.mrb[48].mxu1 %v2322_v19 }
 0x317   : > { %3212 = vmatpush3.bf16.msra.mxu0 %v3596_v41 }
 0x318   : > { %3213 = vmatprep.subr.bf16.mxu0 %v3761_v0 }
 0x31a   : > { %3202 = vmatmul.mubr.bf16.gmra.mrb[24].mxu0 %v1818_v43 }
 0x31b   : > { %3214 = vmatpush3.bf16.msra.mxu0 %v3597_v42  ;;  %3205 = vmatprep.mubr.msk.bf16.mxu0 %vm3762_vm0, %v3761_v0  ;;  %v2717_v42 = vld [vmem:[%s4375_s2 + $0x2] ss:$0 sm:$0xff] }
 0x31c   : > { %3215 = vmatprep.subr.bf16.mxu0 %v3761_v0 }
 0x31f   : > { %3216 = vmatpush3.bf16.msra.mxu0 %v3598_v44  ;;  %v2719_v44 = vld [vmem:[%s4376_s3 + $0x2] ss:$0 sm:$0xff] }
 0x320   : > { %3217 = vmatprep.subr.bf16.mxu0 %v3761_v0 }
 0x322   : > { %3206 = vmatmul.mubr.bf16.gmra.mrb[28].mxu0 %v4116_v1  ;;  %v1929_v1 = vsel %vm809_vm2, %v4089_v51, %v1928_v49 }
 0x323   : > { %3218 = vmatpush3.bf16.msra.mxu0 %v3599_v45  ;;  %3225 = vmatprep.mubr.msk.bf16.mxu0 %vm3762_vm0, %v3761_v0 }
 0x324   : > { %3219 = vmatprep.subr.bf16.mxu0 %v3761_v0 }
 0x327   : > { %3220 = vmatpush3.bf16.msra.mxu0 %v3600_v46 }
 0x328   : > { %3221 = vmatprep.subr.bf16.mxu0 %v3761_v0 }
 0x32b   : > { %3222 = vmatpush3.bf16.msra.mxu0 %v3601_v47 }
 0x32c   : > { %3223 = vmatprep.subr.bf16.mxu0 %v3761_v0 }
 0x32f   : > { %3224 = vmatpush3.bf16.msra.mxu0 %v3602_v48 }
 0x330   : > { %3237 = vmatprep.subr.bf16.mxu0 %v3761_v0 }
 0x332   : > { %3226 = vmatmul.mubr.bf16.vlgmr.msra.gmra.mrb[20].mxu0 %v1929_v1 }
 0x333   : > { %3238 = vmatpush3.bf16.msra.mxu0 %v3603_v50  ;;  %3229 = vmatprep.mubr.msk.bf16.mxu0 %vm3762_vm0, %v3761_v0 }
 0x334   : > { %3239 = vmatprep.subr.bf16.mxu0 %v3761_v0 }
 0x337   : > { %3240 = vmatpush3.bf16.msra.mxu0 %v3604_v52 }
 0x338   : > { %3241 = vmatprep.subr.bf16.mxu0 %v3761_v0 }
 0x33a   : > { %3230 = vmatmul.mubr.bf16.gmra.mrb[24].mxu0 %v1931_v54 }
 0x33b   : > { %3242 = vmatpush3.bf16.msra.mxu0 %v3605_v53  ;;  %3233 = vmatprep.mubr.msk.bf16.mxu0 %vm3762_vm0, %v3761_v0 }
 0x33c   : > { %3243 = vmatprep.subr.bf16.mxu0 %v3761_v0 }
 0x33f   : > { %3244 = vmatpush3.bf16.msra.mxu0 %v3606_v55 }
 0x340   : > { %3245 = vmatprep.subr.bf16.mxu0 %v3761_v0 }
 0x342   : > { %3234 = vmatmul.mubr.bf16.gmra.mrb[32].mxu0 %v4089_v51  ;;  %v2056_v51 = vsel %vm1580_vm8, %v4140_v13, %v2055_v60 }
 0x343   : > { %3246 = vmatpush3.bf16.msra.mxu0 %v3607_v56  ;;  %3253 = vmatprep.mubr.msk.bf16.mxu0 %vm3762_vm0, %v3761_v0 }
 0x344   : > { %3247 = vmatprep.subr.bf16.mxu0 %v3761_v0 }
 0x347   : > { %3248 = vmatpush3.bf16.msra.mxu0 %v3608_v57 }
 0x348   : > { %3249 = vmatprep.subr.bf16.mxu0 %v3761_v0 }
 0x34b   : > { %3250 = vmatpush3.bf16.msra.mxu0 %v3609_v58 }
 0x34c   : > { %3251 = vmatprep.subr.bf16.mxu0 %v3761_v0 }
 0x34f   : > { %3252 = vmatpush3.bf16.msra.mxu0 %v3610_v59 }
 0x350   : > { %3265 = vmatprep.subr.bf16.mxu0 %v3761_v0 }
 0x352   : > { %3254 = vmatmul.mubr.bf16.vlgmr.msra.gmra.mrb[20].mxu0 %v2056_v51 }
 0x353   : > { %3266 = vmatpush3.bf16.msra.mxu0 %v3611_v61  ;;  %3257 = vmatprep.mubr.msk.bf16.mxu0 %vm3762_vm0, %v3761_v0 }
 0x354   : > { %3267 = vmatprep.subr.bf16.mxu0 %v3761_v0 }
 0x357   : > { %3268 = vmatpush3.bf16.msra.mxu0 %v3612_v63 }
 0x358   : > { %3269 = vmatprep.subr.bf16.mxu0 %v3761_v0 }
 0x35a   : > { %3258 = vmatmul.mubr.bf16.gmra.mrb[24].mxu0 %v2058_v3 }
 0x35b   : > { %3270 = vmatpush3.bf16.msra.mxu0 %v3613_v2  ;;  %3261 = vmatprep.mubr.msk.bf16.mxu0 %vm3762_vm0, %v3761_v0 }
 0x35c   : > { %3271 = vmatprep.subr.bf16.mxu0 %v3761_v0 }
 0x35f   : > { %3272 = vmatpush3.bf16.msra.mxu0 %v3614_v5 }
 0x360   : > { %3273 = vmatprep.subr.bf16.mxu0 %v3761_v0 }
 0x362   : > { %3262 = vmatmul.mubr.bf16.gmra.mrb[36].mxu0 %v4140_v13  ;;  %v2191_v13 = vsel %vm2184_vm10, %v2187_v11, %v4218_v40 }
 0x363   : > { %3274 = vmatpush3.bf16.msra.mxu0 %v3615_v6  ;;  %3281 = vmatprep.mubr.msk.bf16.mxu0 %vm3762_vm0, %v3761_v0 }
 0x364   : > { %3275 = vmatprep.subr.bf16.mxu0 %v3761_v0 }
 0x367   : > { %3276 = vmatpush3.bf16.msra.mxu0 %v3616_v7 }
 0x368   : > { %3277 = vmatprep.subr.bf16.mxu0 %v3761_v0 }
 0x36b   : > { %3278 = vmatpush3.bf16.msra.mxu0 %v3617_v8 }
 0x36c   : > { %3279 = vmatprep.subr.bf16.mxu0 %v3761_v0 }
 0x36f   : > { %3280 = vmatpush3.bf16.msra.mxu0 %v3618_v10 }
 0x370   : > { %3293 = vmatprep.subr.bf16.mxu0 %v3761_v0 }
 0x372   : > { %3282 = vmatmul.mubr.bf16.vlgmr.msra.gmra.mrb[20].mxu0 %v2191_v13 }
 0x373   : > { %3294 = vmatpush3.bf16.msra.mxu0 %v4155_v15  ;;  %3285 = vmatprep.mubr.msk.bf16.mxu0 %vm3762_vm0, %v3761_v0 }
 0x374   : > { %3295 = vmatprep.subr.bf16.mxu0 %v3761_v0 }
 0x377   : > { %3296 = vmatpush3.bf16.msra.mxu0 %v4158_v20 }
 0x378   : > { %3297 = vmatprep.subr.bf16.mxu0 %v3761_v0 }
 0x37a   : > { %3286 = vmatmul.mubr.bf16.gmra.mrb[24].mxu0 %v2195_v16 }
 0x37b   : > { %3298 = vmatpush3.bf16.msra.mxu0 %v4164_v22  ;;  %3289 = vmatprep.mubr.msk.bf16.mxu0 %vm3762_vm0, %v3761_v0 }
 0x37c   : > { %3299 = vmatprep.subr.bf16.mxu0 %v3761_v0 }
 0x37f   : > { %3300 = vmatpush3.bf16.msra.mxu0 %v4169_v24 }
 0x380   : > { %3301 = vmatprep.subr.bf16.mxu0 %v3761_v0 }
 0x382   : > { %3290 = vmatmul.mubr.bf16.gmra.mrb[40].mxu0 %v2187_v11 }
 0x383   : > { %3302 = vmatpush3.bf16.msra.mxu0 %v4174_v26  ;;  %3309 = vmatprep.mubr.msk.bf16.mxu0 %vm3762_vm0, %v3761_v0 }
 0x384   : > { %3303 = vmatprep.subr.bf16.mxu0 %v3761_v0 }
 0x387   : > { %3304 = vmatpush3.bf16.msra.mxu0 %v4179_v28 }
 0x388   : > { %3305 = vmatprep.subr.bf16.mxu0 %v3761_v0 }
 0x38b   : > { %3306 = vmatpush3.bf16.msra.mxu0 %v4184_v31 }
 0x38c   : > { %3307 = vmatprep.subr.bf16.mxu0 %v3761_v0 }
 0x38f   : > { %3308 = vmatpush3.bf16.msra.mxu0 %v4189_v36 }
 0x392   : > { %3310 = vmatmul.mubr.bf16.vlgmr.msra.gmra.mrb[20].mxu0 %v4212_v39 }
 0x3e1   : > { %v2419_v62 = vpop.f32.mrb[44].mxu1 }
 0x3e2   : > { %v3315_v15 = vpop.f32.mrb[45].mxu1 }
 0x3e3   : > { %v2422_v20 = vpop.f32.mrb[46].mxu1 }
 0x3e4   : > { %v3316_v22 = vpop.f32.mrb[47].mxu1 }
 0x3e9   : > { %v2427_v24 = vpop.f32.mrb[48].mxu1 }
 0x3ea   : > { %v3319_v26 = vpop.f32.mrb[49].mxu1 }
 0x3eb   : > { %v2429_v12 = vpop.f32.mrb[50].mxu1 }
 0x3ec   : > { %v3320_v14 = vpop.f32.mrb[51].mxu1 }
 0x3f5   : > { %v1919_v17 = vpop.f32.mrb[28].mxu0 }
 0x3f6   : > { %v3207_v28 = vpop.f32.mrb[29].mxu0 }
 0x3f7   : > { %v1921_v18 = vpop.f32.mrb[30].mxu0 }
 0x3f8   : > { %v3208_v19 = vpop.f32.mrb[31].mxu0 }
 0x415   : > { %v2032_v21 = vpop.f32.mrb[32].mxu0 }
 0x416   : > { %v3235_v31 = vpop.f32.mrb[33].mxu0 }
 0x417   : > { %v2034_v23 = vpop.f32.mrb[34].mxu0 }
 0x418   : > { %v3236_v25 = vpop.f32.mrb[35].mxu0 }
 0x435   : > { %v2159_v27 = vpop.f32.mrb[36].mxu0 }
 0x436   : > { %v3263_v36 = vpop.f32.mrb[37].mxu0 }
 0x437   : > { %v2161_v29 = vpop.f32.mrb[38].mxu0 }
 0x438   : > { %v3264_v30 = vpop.f32.mrb[39].mxu0 }
 0x44d   : > { %v2288_v32 = vpop.f32.mrb[24].mxu0 }
 0x44e   : > { %v3339_v33 = vadd.f32 %v2419_v62, %v2288_v32  ;;  %v3287_v34 = vpop.f32.mrb[25].mxu0 }
 0x44f   : > { %v2291_v35 = vpop.f32.mrb[26].mxu0 }
 0x450   : > { %v3288_v37 = vpop.f32.mrb[27].mxu0  ;;  %v2444_v43 = vmul.f32 %v3339_v33, %v2717_v42 }
 0x452   : > { %v2455_v47 = vadd.f32 %v2719_v44, %v2444_v43 }
 0x454   : > { %v2458_v52 = vmax.f32 %v2455_v47, 0.0 }
 0x455   : > { %v2296_v39 = vpop.f32.mrb[40].mxu0 }
 0x456   : > { %v3291_v38 = vpop.f32.mrb[41].mxu0  ;;  %v2465_v55 = vrot.slane %v2458_v52, 2 }
 0x457   : > { %v2298_v40 = vpop.f32.mrb[42].mxu0 }
 0x458   : > { %v3292_v41 = vpop.f32.mrb[43].mxu0 }
 0x465   : > { %v2412_v45 = vpop.f32.mrb[20].mxu0 }
 0x466   : > { %v3311_v46 = vpop.f32.mrb[21].mxu0 }
 0x467   : > { %v2414_v48 = vpop.f32.mrb[22].mxu0 }
 0x468   : > { %v2443_v49 = vmul.f32 %v2717_v42, %v2414_v48  ;;  %v3312_v50 = vpop.f32.mrb[23].mxu0 }
 0x46a   : > { %v2454_v1 = vadd.f32 %v2719_v44, %v2443_v49 }
 0x46c   : > { %v2457_v53 = vmax.f32 %v2454_v1, 0.0 }
 0x46e   : > { %v2464_v54 = vrot.slane %v2457_v53, 2 }
 0x470   : > { %v2466_v56 = vsel %vm809_vm2, %v2464_v54, %v2465_v55 }
 0x471   : > { %v2471_v57 = vsel %vm226_vm6, %v2466_v56, 0.0 }
 0x472   : > { %v2734_v58 = vpack.c.bf16 %v3761_v0, %v2471_v57 }
 0x474   : > { %2735 = vst [vmem:[%s178_s5] sm:$0xff] %v2734_v58  }
 0x475   : > { %3684 = shalt.err (!%p3681_p1)
}
 0x476   : > { %s3685_s8 = scalar_lea.hbm %s4318_s6, 128  ;;  %s3689_s30 = scalar_lea.hbm %s4377_s4, 256 }
 0x477   : > { %p3686_p3 = scmp.ne.s32.totalorder %s4318_s6, %s3685_s8  ;;  %p3690_p7 = scmp.lt.u32.totalorder %s4318_s6, %s4377_s4 }
 0x478   : > { %p3691_p9 = scmp.lt.u32.totalorder %s3689_s30, %s3685_s8  ;;  %p3693_p0 = scmp.lt.u32.totalorder %s3685_s8, %s4318_s6 }
 0x479   : > { %p3687_p5 = pnand %p3686_p3, %p4389_p2 }
 0x47a   : > { %p3692_p12 = por %p3691_p9, %p3690_p7 }
 0x47b   : > { %p3688_p6 = pneg %p3687_p5 }
 0x47c   : > { %p3694_p4 = por %p3693_p0, %p3692_p12 }
 0x47e   : > { %p3695_p8 = pnand %p3694_p4, %p3688_p6 }
 0x480   : > { %3698 = shalt.err (!%p3695_p8)
}
 0x481   : > { %s3766_s24 = smov 64   ;;  %s3767_s26 = smov 4  }
 0x482   : > { %3428 = dma.vmem_to_hbm [thread:$0]  (%p4389_p2), %s4320_s9, 128, %s4318_s6, %s4327_s18, %s3766_s24, %s3766_s24, %s3767_s26  }
 0x483 PF: > { %p3440_p10 = scmp.ge.s32.totalorder %s3755_s20, 2  ;;  %s2514_s10 = sand.u32 1, %s3735_s15  }
 0x484   : > { %p4390_p11 = scmp.ne.s32.totalorder %s4383_s27, 0  ;;  %s2515_s11 = scalar_lea.sflag [#allocation6], %s2514_s10 }
 0x486   : > { %p3435_p13 = pnand %p3440_p10, %p4390_p11 }
 0x488   : > { %3730 = dma.done.wait (!%p3435_p13), %s2515_s11, 128  }
 0x489   : > { %3732 = vsyncadd (!%p3435_p13), %s2515_s11, 4294967168  ;;  %s18_s20 = sadd.s32 1, %s3755_s20   ;;  %s4391_s15 = smov %s3739_s16 }
 0x48a   : > { %p15_p1 = scmp.ge.s32.totalorder %s18_s20, 4   ;;  %s4392_s16 = smov %s3743_s17 }
 0x48b   : > { %s4393_s17 = smov %s3846_s28  ;;  %s4394_s18 = smov %s3751_s19 }
 0x48c   : > { %s4395_s19 = smov %s4397_s23  ;;  %17 = sbr.rel (!%p15_p1) target bundleno = 5 (0x5), region = 92 }
 0x493   :  { %2520 = vsyncpa [#allocation5], 1 }
 0x494   :  { %2522 = vsyncpa [#allocation5 + $0x1], 1 }
 0x495   :  { %2523 = vsyncpa [#allocation6], 1 }
 0x496   :  { %2525 = vsyncpa [#allocation6 + $0x1], 1 }
 0x497   :  { %2526 = vsyncmov [#allocation3] }
 0x49a   :  { %s2527_s25 = vpop.sfrf %2526 }
 0x49b   :  { %p2727_p2 = scmp.ne.s32.totalorder %s2527_s25, 0 }
 0x49d   :  { %2531 = shalt.err (%p2727_p2)  }

</bundles_post_ra>
